<compile_context>
chip_gen: v6e
topology: v6e:2x2x1
jax: 0.10.0
libtpu: 0.0.40
codegen_flags: <defaults>
</compile_context>

<pallas_src>
import jax
import jax.numpy as jnp
from jax.experimental import pallas as pl
from jax.experimental.pallas import tpu as pltpu

# Layer widths of SimpleFNN: in -> 500 -> 500 -> 200 -> 300 -> 200 -> 100 -> out
HIDDEN = [500, 500, 200, 300, 200, 100]


def _round_up(n, m):
    return (n + m - 1) // m * m


def _cdiv(a, b):
    return -(-a // b)


def _pad2d(a, rows, cols):
    return jnp.pad(a, ((0, rows - a.shape[0]), (0, cols - a.shape[1])))


def _tensorcores_per_chip():
    """2 on v7x-class chips (megacore grid sharding), else 1 (v5e/v6e)."""
    try:
        kind = jax.devices()[0].device_kind.lower()
    except Exception:
        return 1
    return 2 if "v7" in kind else 1


# --------------------------------------------------------------------------- #
# Kernel
# --------------------------------------------------------------------------- #
def _fnn_kernel(x_ref, *refs):
    """refs = (w1, b1, w2, b2, ..., w7, b7, out_ref).

    Whole 7-layer hot path in one grid step.  Matmuls take bf16 operands and
    accumulate in f32 on the MXU; bias add and ReLU stay in f32.
    """
    out_ref = refs[-1]
    param_refs = refs[:-1]
    n_layers = len(param_refs) // 2
    compute_dtype = param_refs[0].dtype

    h = x_ref[...].astype(compute_dtype)        # f32 tile -> bf16 (VPU, hidden under MXU)
    for l in range(n_layers):
        w_ref = param_refs[2 * l]
        b_ref = param_refs[2 * l + 1]
        y = jnp.dot(h, w_ref[...], preferred_element_type=jnp.float32)
        y = y + b_ref[...]
        if l < n_layers - 1:
            h = jnp.maximum(y, 0.0).astype(compute_dtype)   # ReLU; dropout = id (eval)
        else:
            h = y                                           # final layer stays f32
    out_ref[...] = h.astype(out_ref.dtype)


# --------------------------------------------------------------------------- #
# One-time parameter preparation (hoisted out of the per-call path)
# --------------------------------------------------------------------------- #
def prepare_params(weights, biases, param_dtype=jnp.bfloat16):
    """Pad feature dims and cast params to the MXU dtype ONCE (at load time).

    weights[l]: (in_l, out_l)   (transposed vs. PyTorch nn.Linear.weight)
    biases[l]:  (out_l,) or (1, out_l)

    Hidden/output dims are padded to multiples of 128 (lane-dense matmuls and
    output store); the input dim is left as-is (rounded to a multiple of 8 only
    if needed).
    """
    n_layers = len(weights)
    dims = [weights[0].shape[0]] + [w.shape[1] for w in weights]
    in_dim = dims[0]
    dims_p = [in_dim if in_dim % 8 == 0 else _round_up(in_dim, 8)]
    dims_p += [_round_up(d, 128) for d in dims[1:]]

    weights_p, biases_p = [], []
    for l in range(n_layers):
        w = jnp.asarray(weights[l], jnp.float32)
        b = jnp.reshape(jnp.asarray(biases[l], jnp.float32), (1, -1))
        weights_p.append(_pad2d(w, dims_p[l], dims_p[l + 1]).astype(param_dtype))
        biases_p.append(_pad2d(b, 1, dims_p[l + 1]).astype(jnp.float32))
    return weights_p, biases_p


# --------------------------------------------------------------------------- #
# Forward wrapper
# --------------------------------------------------------------------------- #
def simple_fnn_forward(x, weights_p, biases_p, *, out_dim, batch_tile=512):
    """Fused SimpleFNN forward.

    x:          (B, input_size) float32
    weights_p / biases_p: output of prepare_params() (padded, bf16 weights /
                f32 biases) -- no per-call padding or casting happens here.
    out_dim:    true (unpadded) output width.
    """
    B = x.shape[0]
    in_dim_p = weights_p[0].shape[0]
    out_dim_p = weights_p[-1].shape[1]

    # ---- batch tiling: balanced tiles, bounded padding ----------------------
    n_tiles = _cdiv(B, batch_tile)
    # Split a single full-batch tile across cores only on 2-TensorCore chips
    # (v7x) and only when each core still gets >= 256 rows.  On 1-TC v5e/v6e
    # the grid is a serial loop, so extra steps are pure overhead.
    if n_tiles == 1 and B >= 512 and _tensorcores_per_chip() >= 2:
        n_tiles = 2
    if n_tiles == 1 and B % 8 == 0:
        bt = B                                   # exact fit: zero batch padding
    else:
        bt = _round_up(_cdiv(B, n_tiles), 16)    # 16-row aligned (bf16 packing)
    grid = _cdiv(B, bt)
    B_pad = grid * bt

    # ---- input: keep f32, avoid pad/cast round trip when possible -----------
    if B_pad == B and x.shape[1] == in_dim_p:
        x_in = x                                 # straight from HBM; cast in kernel
    else:
        # Padding unavoidable: do the (cheaper) bf16 pad here.
        x_in = _pad2d(x, B_pad, in_dim_p).astype(weights_p[0].dtype)

    in_specs = [pl.BlockSpec((bt, in_dim_p), lambda i: (i, 0))]
    inputs = [x_in]
    for w_p, b_p in zip(weights_p, biases_p):
        # Constant index_map: weight/bias blocks are DMA'd once, not per step.
        in_specs.append(pl.BlockSpec(w_p.shape, lambda i: (0, 0)))
        in_specs.append(pl.BlockSpec(b_p.shape, lambda i: (0, 0)))
        inputs.extend([w_p, b_p])

    out_specs = pl.BlockSpec((bt, out_dim_p), lambda i: (i, 0))

    # ---- advisory cost estimate ----------------------------------------------
    flops = 2 * B_pad * sum(w.shape[0] * w.shape[1] for w in weights_p)
    bytes_accessed = (int(x_in.size) * x_in.dtype.itemsize
                      + sum(int(p.size) * p.dtype.itemsize
                            for p in weights_p + biases_p)
                      + B_pad * out_dim_p * 4)

    out_padded = pl.pallas_call(
        _fnn_kernel,
        out_shape=jax.ShapeDtypeStruct((B_pad, out_dim_p), jnp.float32),
        grid_spec=pltpu.PrefetchScalarGridSpec(
            num_scalar_prefetch=0,
            grid=(grid,),
            in_specs=in_specs,
            out_specs=out_specs,
        ),
        compiler_params=pltpu.CompilerParams(
            dimension_semantics=("parallel",),
            vmem_limit_bytes=32 * 1024 * 1024,   # explicit: safe on v5e/v6e/v7x
        ),
        cost_estimate=pl.CostEstimate(
            flops=flops, transcendentals=0, bytes_accessed=bytes_accessed),
    )(*inputs)

    # Strip batch / lane padding outside the kernel.
    return out_padded[:B, :out_dim].astype(x.dtype)


# --------------------------------------------------------------------------- #
# Param init + references (for the self-check)
# --------------------------------------------------------------------------- #
def init_params(input_size, output_size, key):
    """Deterministic init matching PyTorch nn.Linear default:
    U(-1/sqrt(fan_in), 1/sqrt(fan_in)) for both weight and bias."""
    dims = [input_size] + HIDDEN + [output_size]
    weights, biases = [], []
    for l in range(len(dims) - 1):
        fan_in, fan_out = dims[l], dims[l + 1]
        key, kw, kb = jax.random.split(key, 3)
        bound = 1.0 / (fan_in ** 0.5)
        w = jax.random.uniform(kw, (fan_in, fan_out), jnp.float32, -bound, bound)
        b = jax.random.uniform(kb, (1, fan_out), jnp.float32, -bound, bound)
        weights.append(w)
        biases.append(b)
    return weights, biases


def _reference_forward_f32(x, weights, biases):
    h = x
    for l, (w, b) in enumerate(zip(weights, biases)):
        h = h @ w + jnp.reshape(b, (1, -1))
        if l < len(weights) - 1:
            h = jnp.maximum(h, 0.0)
    return h


def _reference_forward_bf16(x, weights, biases):
    """Same bf16-operand / f32-accumulate recipe as the kernel."""
    h = x.astype(jnp.bfloat16)
    for l, (w, b) in enumerate(zip(weights, biases)):
        y = jnp.dot(h, w.astype(jnp.bfloat16),
                    preferred_element_type=jnp.float32)
        y = y + jnp.reshape(b, (1, -1)).astype(jnp.float32)
        if l < len(weights) - 1:
            y = jnp.maximum(y, 0.0)
            h = y.astype(jnp.bfloat16)
        else:
            h = y
    return h


if __name__ == "__main__":
    input_size = 32
    output_size = 10
    batch = 8

    key = jax.random.PRNGKey(0)
    key, kx = jax.random.split(key)
    x = jax.random.normal(kx, (batch, input_size), jnp.float32)

    weights, biases = init_params(input_size, output_size, key)

    # Hoisted out of the per-call path: pad + bf16-cast params exactly once.
    weights_p, biases_p = prepare_params(weights, biases)

    fwd = jax.jit(simple_fnn_forward, static_argnames=("out_dim", "batch_tile"))
    out = fwd(x, weights_p, biases_p, out_dim=output_size)
    out = jax.block_until_ready(out)

    assert out.shape == (batch, output_size)

    # Tight-ish check against a reference using the same bf16/f32 recipe.
    ref_bf16 = _reference_forward_bf16(x, weights, biases)
    assert jnp.allclose(out, ref_bf16, atol=2e-2, rtol=2e-2)

    # Loose sanity check against the pure-f32 module semantics.
    ref_f32 = _reference_forward_f32(x, weights, biases)
    assert jnp.allclose(out, ref_f32, atol=0.15, rtol=0.1)

    print("KERNEL_OK")
</pallas_src>

<mosaic_0001>
module attributes {stable_mosaic.version = 11 : i64} {
  func.func @_fnn_kernel(%arg0: i32, %arg1: memref<8x32xf32, #tpu.memory_space<vmem>>, %arg2: memref<32x512xbf16, #tpu.memory_space<vmem>>, %arg3: memref<1x512xf32, #tpu.memory_space<vmem>>, %arg4: memref<512x512xbf16, #tpu.memory_space<vmem>>, %arg5: memref<1x512xf32, #tpu.memory_space<vmem>>, %arg6: memref<512x256xbf16, #tpu.memory_space<vmem>>, %arg7: memref<1x256xf32, #tpu.memory_space<vmem>>, %arg8: memref<256x384xbf16, #tpu.memory_space<vmem>>, %arg9: memref<1x384xf32, #tpu.memory_space<vmem>>, %arg10: memref<384x256xbf16, #tpu.memory_space<vmem>>, %arg11: memref<1x256xf32, #tpu.memory_space<vmem>>, %arg12: memref<256x128xbf16, #tpu.memory_space<vmem>>, %arg13: memref<1x128xf32, #tpu.memory_space<vmem>>, %arg14: memref<128x128xbf16, #tpu.memory_space<vmem>>, %arg15: memref<1x128xf32, #tpu.memory_space<vmem>>, %arg16: memref<8x128xf32, #tpu.memory_space<vmem>>) attributes {dimension_semantics = [#tpu.dimension_semantics<parallel>], iteration_bounds = array<i64: 1>, scalar_prefetch = 0 : i64, scratch_operands = 0 : i64, tpu.core_type = #tpu.core_type<tc>, window_params = [{transform_indices = @transform_0, window_bounds = array<i64: 8, 32>}, {pipeline_mode = #tpu.pipeline_mode<synchronous>, transform_indices = @transform_1, window_bounds = array<i64: 32, 512>}, {pipeline_mode = #tpu.pipeline_mode<synchronous>, transform_indices = @transform_2, window_bounds = array<i64: 1, 512>}, {pipeline_mode = #tpu.pipeline_mode<synchronous>, transform_indices = @transform_3, window_bounds = array<i64: 512, 512>}, {pipeline_mode = #tpu.pipeline_mode<synchronous>, transform_indices = @transform_4, window_bounds = array<i64: 1, 512>}, {pipeline_mode = #tpu.pipeline_mode<synchronous>, transform_indices = @transform_5, window_bounds = array<i64: 512, 256>}, {pipeline_mode = #tpu.pipeline_mode<synchronous>, transform_indices = @transform_6, window_bounds = array<i64: 1, 256>}, {pipeline_mode = #tpu.pipeline_mode<synchronous>, transform_indices = @transform_7, window_bounds = array<i64: 256, 384>}, {pipeline_mode = #tpu.pipeline_mode<synchronous>, transform_indices = @transform_8, window_bounds = array<i64: 1, 384>}, {pipeline_mode = #tpu.pipeline_mode<synchronous>, transform_indices = @transform_9, window_bounds = array<i64: 384, 256>}, {pipeline_mode = #tpu.pipeline_mode<synchronous>, transform_indices = @transform_10, window_bounds = array<i64: 1, 256>}, {pipeline_mode = #tpu.pipeline_mode<synchronous>, transform_indices = @transform_11, window_bounds = array<i64: 256, 128>}, {pipeline_mode = #tpu.pipeline_mode<synchronous>, transform_indices = @transform_12, window_bounds = array<i64: 1, 128>}, {pipeline_mode = #tpu.pipeline_mode<synchronous>, transform_indices = @transform_13, window_bounds = array<i64: 128, 128>}, {pipeline_mode = #tpu.pipeline_mode<synchronous>, transform_indices = @transform_14, window_bounds = array<i64: 1, 128>}, {transform_indices = @transform_15, window_bounds = array<i64: 8, 128>}]} {
    %c0 = arith.constant 0 : index
    %c0_0 = arith.constant 0 : index
    %0 = vector.load %arg1[%c0, %c0_0] : memref<8x32xf32, #tpu.memory_space<vmem>>, vector<8x32xf32>
    %1 = arith.truncf %0 : vector<8x32xf32> to vector<8x32xbf16>
    %c0_1 = arith.constant 0 : index
    %c0_2 = arith.constant 0 : index
    %2 = vector.load %arg2[%c0_1, %c0_2] : memref<32x512xbf16, #tpu.memory_space<vmem>>, vector<32x512xbf16>
    %cst = arith.constant dense<0.000000e+00> : vector<8x512xf32>
    %3 = tpu.matmul %1, %2, %cst {dimension_numbers = #tpu.dot_dimension_numbers<[1], [0], [0], [1], [0, 0, 1, 1], [], []>} : vector<8x32xbf16>, vector<32x512xbf16>, vector<8x512xf32> -> vector<8x512xf32>
    %c0_3 = arith.constant 0 : index
    %c0_4 = arith.constant 0 : index
    %4 = vector.load %arg3[%c0_3, %c0_4] : memref<1x512xf32, #tpu.memory_space<vmem>>, vector<1x512xf32>
    %5 = vector.broadcast %4 : vector<1x512xf32> to vector<8x512xf32>
    %6 = arith.addf %3, %5 : vector<8x512xf32>
    %cst_5 = arith.constant 0.000000e+00 : f32
    %7 = vector.broadcast %cst_5 : f32 to vector<8x512xf32>
    %8 = arith.maximumf %6, %7 : vector<8x512xf32>
    %9 = arith.truncf %8 : vector<8x512xf32> to vector<8x512xbf16>
    %c0_6 = arith.constant 0 : index
    %c0_7 = arith.constant 0 : index
    %10 = vector.load %arg4[%c0_6, %c0_7] : memref<512x512xbf16, #tpu.memory_space<vmem>>, vector<512x512xbf16>
    %cst_8 = arith.constant dense<0.000000e+00> : vector<8x512xf32>
    %11 = tpu.matmul %9, %10, %cst_8 {dimension_numbers = #tpu.dot_dimension_numbers<[1], [0], [0], [1], [0, 0, 1, 1], [], []>} : vector<8x512xbf16>, vector<512x512xbf16>, vector<8x512xf32> -> vector<8x512xf32>
    %c0_9 = arith.constant 0 : index
    %c0_10 = arith.constant 0 : index
    %12 = vector.load %arg5[%c0_9, %c0_10] : memref<1x512xf32, #tpu.memory_space<vmem>>, vector<1x512xf32>
    %13 = vector.broadcast %12 : vector<1x512xf32> to vector<8x512xf32>
    %14 = arith.addf %11, %13 : vector<8x512xf32>
    %cst_11 = arith.constant 0.000000e+00 : f32
    %15 = vector.broadcast %cst_11 : f32 to vector<8x512xf32>
    %16 = arith.maximumf %14, %15 : vector<8x512xf32>
    %17 = arith.truncf %16 : vector<8x512xf32> to vector<8x512xbf16>
    %c0_12 = arith.constant 0 : index
    %c0_13 = arith.constant 0 : index
    %18 = vector.load %arg6[%c0_12, %c0_13] : memref<512x256xbf16, #tpu.memory_space<vmem>>, vector<512x256xbf16>
    %cst_14 = arith.constant dense<0.000000e+00> : vector<8x256xf32>
    %19 = tpu.matmul %17, %18, %cst_14 {dimension_numbers = #tpu.dot_dimension_numbers<[1], [0], [0], [1], [0, 0, 1, 1], [], []>} : vector<8x512xbf16>, vector<512x256xbf16>, vector<8x256xf32> -> vector<8x256xf32>
    %c0_15 = arith.constant 0 : index
    %c0_16 = arith.constant 0 : index
    %20 = vector.load %arg7[%c0_15, %c0_16] : memref<1x256xf32, #tpu.memory_space<vmem>>, vector<1x256xf32>
    %21 = vector.broadcast %20 : vector<1x256xf32> to vector<8x256xf32>
    %22 = arith.addf %19, %21 : vector<8x256xf32>
    %cst_17 = arith.constant 0.000000e+00 : f32
    %23 = vector.broadcast %cst_17 : f32 to vector<8x256xf32>
    %24 = arith.maximumf %22, %23 : vector<8x256xf32>
    %25 = arith.truncf %24 : vector<8x256xf32> to vector<8x256xbf16>
    %c0_18 = arith.constant 0 : index
    %c0_19 = arith.constant 0 : index
    %26 = vector.load %arg8[%c0_18, %c0_19] : memref<256x384xbf16, #tpu.memory_space<vmem>>, vector<256x384xbf16>
    %cst_20 = arith.constant dense<0.000000e+00> : vector<8x384xf32>
    %27 = tpu.matmul %25, %26, %cst_20 {dimension_numbers = #tpu.dot_dimension_numbers<[1], [0], [0], [1], [0, 0, 1, 1], [], []>} : vector<8x256xbf16>, vector<256x384xbf16>, vector<8x384xf32> -> vector<8x384xf32>
    %c0_21 = arith.constant 0 : index
    %c0_22 = arith.constant 0 : index
    %28 = vector.load %arg9[%c0_21, %c0_22] : memref<1x384xf32, #tpu.memory_space<vmem>>, vector<1x384xf32>
    %29 = vector.broadcast %28 : vector<1x384xf32> to vector<8x384xf32>
    %30 = arith.addf %27, %29 : vector<8x384xf32>
    %cst_23 = arith.constant 0.000000e+00 : f32
    %31 = vector.broadcast %cst_23 : f32 to vector<8x384xf32>
    %32 = arith.maximumf %30, %31 : vector<8x384xf32>
    %33 = arith.truncf %32 : vector<8x384xf32> to vector<8x384xbf16>
    %c0_24 = arith.constant 0 : index
    %c0_25 = arith.constant 0 : index
    %34 = vector.load %arg10[%c0_24, %c0_25] : memref<384x256xbf16, #tpu.memory_space<vmem>>, vector<384x256xbf16>
    %cst_26 = arith.constant dense<0.000000e+00> : vector<8x256xf32>
    %35 = tpu.matmul %33, %34, %cst_26 {dimension_numbers = #tpu.dot_dimension_numbers<[1], [0], [0], [1], [0, 0, 1, 1], [], []>} : vector<8x384xbf16>, vector<384x256xbf16>, vector<8x256xf32> -> vector<8x256xf32>
    %c0_27 = arith.constant 0 : index
    %c0_28 = arith.constant 0 : index
    %36 = vector.load %arg11[%c0_27, %c0_28] : memref<1x256xf32, #tpu.memory_space<vmem>>, vector<1x256xf32>
    %37 = vector.broadcast %36 : vector<1x256xf32> to vector<8x256xf32>
    %38 = arith.addf %35, %37 : vector<8x256xf32>
    %cst_29 = arith.constant 0.000000e+00 : f32
    %39 = vector.broadcast %cst_29 : f32 to vector<8x256xf32>
    %40 = arith.maximumf %38, %39 : vector<8x256xf32>
    %41 = arith.truncf %40 : vector<8x256xf32> to vector<8x256xbf16>
    %c0_30 = arith.constant 0 : index
    %c0_31 = arith.constant 0 : index
    %42 = vector.load %arg12[%c0_30, %c0_31] : memref<256x128xbf16, #tpu.memory_space<vmem>>, vector<256x128xbf16>
    %cst_32 = arith.constant dense<0.000000e+00> : vector<8x128xf32>
    %43 = tpu.matmul %41, %42, %cst_32 {dimension_numbers = #tpu.dot_dimension_numbers<[1], [0], [0], [1], [0, 0, 1, 1], [], []>} : vector<8x256xbf16>, vector<256x128xbf16>, vector<8x128xf32> -> vector<8x128xf32>
    %c0_33 = arith.constant 0 : index
    %c0_34 = arith.constant 0 : index
    %44 = vector.load %arg13[%c0_33, %c0_34] : memref<1x128xf32, #tpu.memory_space<vmem>>, vector<1x128xf32>
    %45 = vector.broadcast %44 : vector<1x128xf32> to vector<8x128xf32>
    %46 = arith.addf %43, %45 : vector<8x128xf32>
    %cst_35 = arith.constant 0.000000e+00 : f32
    %47 = vector.broadcast %cst_35 : f32 to vector<8x128xf32>
    %48 = arith.maximumf %46, %47 : vector<8x128xf32>
    %49 = arith.truncf %48 : vector<8x128xf32> to vector<8x128xbf16>
    %c0_36 = arith.constant 0 : index
    %c0_37 = arith.constant 0 : index
    %50 = vector.load %arg14[%c0_36, %c0_37] : memref<128x128xbf16, #tpu.memory_space<vmem>>, vector<128x128xbf16>
    %cst_38 = arith.constant dense<0.000000e+00> : vector<8x128xf32>
    %51 = tpu.matmul %49, %50, %cst_38 {dimension_numbers = #tpu.dot_dimension_numbers<[1], [0], [0], [1], [0, 0, 1, 1], [], []>} : vector<8x128xbf16>, vector<128x128xbf16>, vector<8x128xf32> -> vector<8x128xf32>
    %c0_39 = arith.constant 0 : index
    %c0_40 = arith.constant 0 : index
    %52 = vector.load %arg15[%c0_39, %c0_40] : memref<1x128xf32, #tpu.memory_space<vmem>>, vector<1x128xf32>
    %53 = vector.broadcast %52 : vector<1x128xf32> to vector<8x128xf32>
    %54 = arith.addf %51, %53 : vector<8x128xf32>
    %c0_41 = arith.constant 0 : index
    %c0_42 = arith.constant 0 : index
    %55 = vector.load %arg16[%c0_41, %c0_42] : memref<8x128xf32, #tpu.memory_space<vmem>>, vector<8x128xf32>
    tpu.vector_store %arg16[%c0_41, %c0_42], %54 {strides = array<i32>} : memref<8x128xf32, #tpu.memory_space<vmem>>, vector<8x128xf32>,
    return
  }
  func.func @transform_0(%arg0: i32) -> (i32, i32) {
    %c0_i32 = arith.constant 0 : i32
    %c0_i32_0 = arith.constant 0 : i32
    return %arg0, %c0_i32 : i32, i32
  }
  func.func @transform_1(%arg0: i32) -> (i32, i32) {
    %c0_i32 = arith.constant 0 : i32
    %c0_i32_0 = arith.constant 0 : i32
    %c0_i32_1 = arith.constant 0 : i32
    return %c0_i32, %c0_i32_0 : i32, i32
  }
  func.func @transform_2(%arg0: i32) -> (i32, i32) {
    %c0_i32 = arith.constant 0 : i32
    %c0_i32_0 = arith.constant 0 : i32
    %c0_i32_1 = arith.constant 0 : i32
    return %c0_i32, %c0_i32_0 : i32, i32
  }
  func.func @transform_3(%arg0: i32) -> (i32, i32) {
    %c0_i32 = arith.constant 0 : i32
    %c0_i32_0 = arith.constant 0 : i32
    %c0_i32_1 = arith.constant 0 : i32
    return %c0_i32, %c0_i32_0 : i32, i32
  }
  func.func @transform_4(%arg0: i32) -> (i32, i32) {
    %c0_i32 = arith.constant 0 : i32
    %c0_i32_0 = arith.constant 0 : i32
    %c0_i32_1 = arith.constant 0 : i32
    return %c0_i32, %c0_i32_0 : i32, i32
  }
  func.func @transform_5(%arg0: i32) -> (i32, i32) {
    %c0_i32 = arith.constant 0 : i32
    %c0_i32_0 = arith.constant 0 : i32
    %c0_i32_1 = arith.constant 0 : i32
    return %c0_i32, %c0_i32_0 : i32, i32
  }
  func.func @transform_6(%arg0: i32) -> (i32, i32) {
    %c0_i32 = arith.constant 0 : i32
    %c0_i32_0 = arith.constant 0 : i32
    %c0_i32_1 = arith.constant 0 : i32
    return %c0_i32, %c0_i32_0 : i32, i32
  }
  func.func @transform_7(%arg0: i32) -> (i32, i32) {
    %c0_i32 = arith.constant 0 : i32
    %c0_i32_0 = arith.constant 0 : i32
    %c0_i32_1 = arith.constant 0 : i32
    return %c0_i32, %c0_i32_0 : i32, i32
  }
  func.func @transform_8(%arg0: i32) -> (i32, i32) {
    %c0_i32 = arith.constant 0 : i32
    %c0_i32_0 = arith.constant 0 : i32
    %c0_i32_1 = arith.constant 0 : i32
    return %c0_i32, %c0_i32_0 : i32, i32
  }
  func.func @transform_9(%arg0: i32) -> (i32, i32) {
    %c0_i32 = arith.constant 0 : i32
    %c0_i32_0 = arith.constant 0 : i32
    %c0_i32_1 = arith.constant 0 : i32
    return %c0_i32, %c0_i32_0 : i32, i32
  }
  func.func @transform_10(%arg0: i32) -> (i32, i32) {
    %c0_i32 = arith.constant 0 : i32
    %c0_i32_0 = arith.constant 0 : i32
    %c0_i32_1 = arith.constant 0 : i32
    return %c0_i32, %c0_i32_0 : i32, i32
  }
  func.func @transform_11(%arg0: i32) -> (i32, i32) {
    %c0_i32 = arith.constant 0 : i32
    %c0_i32_0 = arith.constant 0 : i32
    %c0_i32_1 = arith.constant 0 : i32
    return %c0_i32, %c0_i32_0 : i32, i32
  }
  func.func @transform_12(%arg0: i32) -> (i32, i32) {
    %c0_i32 = arith.constant 0 : i32
    %c0_i32_0 = arith.constant 0 : i32
    %c0_i32_1 = arith.constant 0 : i32
    return %c0_i32, %c0_i32_0 : i32, i32
  }
  func.func @transform_13(%arg0: i32) -> (i32, i32) {
    %c0_i32 = arith.constant 0 : i32
    %c0_i32_0 = arith.constant 0 : i32
    %c0_i32_1 = arith.constant 0 : i32
    return %c0_i32, %c0_i32_0 : i32, i32
  }
  func.func @transform_14(%arg0: i32) -> (i32, i32) {
    %c0_i32 = arith.constant 0 : i32
    %c0_i32_0 = arith.constant 0 : i32
    %c0_i32_1 = arith.constant 0 : i32
    return %c0_i32, %c0_i32_0 : i32, i32
  }
  func.func @transform_15(%arg0: i32) -> (i32, i32) {
    %c0_i32 = arith.constant 0 : i32
    %c0_i32_0 = arith.constant 0 : i32
    return %arg0, %c0_i32 : i32, i32
  }
}

</mosaic_0001>

<bundles_post_ra>
// kernel: simple_fnn_forward.1
= control target key start
LH: loop header
LB: loop body
LE: loop exit
PB: predicated region body
PF: predicated region fallthrough
CT: control target
= control target key end

     0   :  { %20 = vsyncpa [#allocation3], 0  ;;  %s4150_s0 = inlined_call_operand.hbm [shape: f32[8,32], index: 0, kind: input, shape index: {}]   ;;  %s4151_s1 = inlined_call_operand.hbm [shape: bf16[32,512], index: 1, kind: input, shape index: {}]   ;;  %s4152_s2 = inlined_call_operand.vmem [shape: f32[1,512], index: 2, kind: input, shape index: {}]   ;;  %s4153_s3 = inlined_call_operand.hbm [shape: bf16[512,512], index: 3, kind: input, shape index: {}]   ;;  %s4154_s4 = inlined_call_operand.vmem [shape: f32[1,512], index: 4, kind: input, shape index: {}]   ;;  %s4155_s5 = inlined_call_operand.hbm [shape: bf16[512,256], index: 5, kind: input, shape index: {}]   ;;  %s4156_s6 = inlined_call_operand.vmem [shape: f32[1,256], index: 6, kind: input, shape index: {}]   ;;  %s4157_s7 = inlined_call_operand.hbm [shape: bf16[256,384], index: 7, kind: input, shape index: {}]   ;;  %s4158_s8 = inlined_call_operand.vmem [shape: f32[1,384], index: 8, kind: input, shape index: {}]   ;;  %s4159_s9 = inlined_call_operand.hbm [shape: bf16[384,256], index: 9, kind: input, shape index: {}]   ;;  %s4160_s10 = inlined_call_operand.vmem [shape: f32[1,256], index: 10, kind: input, shape index: {}]   ;;  %s4161_s11 = inlined_call_operand.hbm [shape: bf16[256,128], index: 11, kind: input, shape index: {}]   ;;  %s4162_s12 = inlined_call_operand.vmem [shape: f32[1,128], index: 12, kind: input, shape index: {}]   ;;  %s4163_s13 = inlined_call_operand.hbm [shape: bf16[128,128], index: 13, kind: input, shape index: {}]   ;;  %s4164_s14 = inlined_call_operand.vmem [shape: f32[1,128], index: 14, kind: input, shape index: {}]   ;;  %s4165_s15 = inlined_call_operand.hbm [shape: f32[8,128], index: 15, kind: output, shape index: {}]  }
   0x1   :  { %21 = vsyncpa [#allocation6], 0 }
   0x2   :  { %22 = vsyncpa [#allocation9], 0 }
   0x3   :  { %23 = vsyncpa [#allocation12], 0 }
   0x4   :  { %24 = vsyncpa [#allocation15], 0 }
   0x5   :  { %25 = vsyncpa [#allocation4], 0  ;;  %s3956_s18 = smov [#allocation5]  }
   0x6   :  { %s41_s19 = sshll.u32 %s3956_s18, 4  ;;  %s42_s19 = int_to_ptr.vmem [resolvable:$true] %s41_s19 }
   0x7   :  { %s3772_s20 = scalar_lea.vmem %s42_s19, 1024  ;;  %p3777_p1 = scmp.lt.s32.totalorder %s42_s19, %s42_s19 }
   0x8   :  { %p3773_p0 = scmp.ne.s32.totalorder %s42_s19, %s3772_s20  ;;  %p3778_p2 = scmp.lt.s32.totalorder %s3772_s20, %s3772_s20 }
   0xa   :  { %p3779_p3 = por %p3778_p2, %p3777_p1 }
   0xc   :  { %p3780_p4 = pnand %p3779_p3, %p3773_p0 }
   0xe   :  { %3783 = shalt.err (!%p3780_p4)
}
   0xf   :  { %s3957_s21 = smov 256   ;;  %s3958_s22 = smov 16  }
  0x10   :  { %47 = dma.hbm_to_vmem [thread:$0]  %s4151_s1, 1024, %s42_s19, [#allocation6], %s3957_s21, %s3957_s21, %s3958_s22  }
  0x11   :  { %s3959_s25 = smov [#allocation8]  }
  0x12   :  { %s69_s26 = sshll.u32 %s3959_s25, 4  ;;  %s70_s26 = int_to_ptr.vmem [resolvable:$true] %s69_s26 }
  0x13   :  { %s3792_s27 = scalar_lea.vmem %s70_s26, 8192  ;;  %p3797_p6 = scmp.lt.s32.totalorder %s70_s26, %s70_s26 }
  0x14   :  { %p3793_p5 = scmp.ne.s32.totalorder %s70_s26, %s3792_s27  ;;  %p3798_p7 = scmp.lt.s32.totalorder %s3792_s27, %s3792_s27 }
  0x16   :  { %p3799_p8 = por %p3798_p7, %p3797_p6 }
  0x18   :  { %p3800_p9 = pnand %p3799_p8, %p3793_p5 }
  0x1a   :  { %3803 = shalt.err (!%p3800_p9)
}
  0x1b   :  { %s3960_s28 = smov 128   ;;  %s3961_s29 = smov 8  }
  0x1c   :  { %75 = dma.hbm_to_vmem [thread:$0]  %s4155_s5, 8192, %s70_s26, [#allocation9], %s3960_s28, %s3960_s28, %s3961_s29  }
  0x1d   :  { %s3962_s17 = smov [#allocation11]   ;;  %s3963_s20 = smov [#allocation2]  }
  0x1e   :  { %s97_s18 = sshll.u32 %s3962_s17, 4  ;;  %s32_s1 = sshll.u32 %s3963_s20, 4  ;;  %s98_s18 = int_to_ptr.vmem [resolvable:$true] %s97_s18  ;;  %s33_s1 = int_to_ptr.vmem [resolvable:$true] %s32_s1 }
  0x1f   :  { %s3812_s19 = scalar_lea.vmem %s98_s18, 6144  ;;  %p3817_p11 = scmp.lt.s32.totalorder %s98_s18, %s98_s18 }
  0x20   :  { %p3813_p10 = scmp.ne.s32.totalorder %s98_s18, %s3812_s19  ;;  %p3818_p12 = scmp.lt.s32.totalorder %s3812_s19, %s3812_s19 }
  0x22   :  { %p3819_p13 = por %p3818_p12, %p3817_p11 }
  0x24   :  { %p3820_p0 = pnand %p3819_p13, %p3813_p10 }
  0x26   :  { %3823 = shalt.err (!%p3820_p0)
}
  0x27   :  { %103 = dma.hbm_to_vmem [thread:$0]  %s4159_s9, 6144, %s98_s18, [#allocation12], %s3960_s28, %s3960_s28, %s3961_s29  }
  0x28   :  { %s3832_s25 = scalar_lea.vmem %s33_s1, 128  ;;  %p3837_p2 = scmp.lt.s32.totalorder %s33_s1, %s33_s1 }
  0x29   :  { %p3833_p1 = scmp.ne.s32.totalorder %s33_s1, %s3832_s25  ;;  %p3838_p3 = scmp.lt.s32.totalorder %s3832_s25, %s3832_s25 }
  0x2b   :  { %p3839_p4 = por %p3838_p3, %p3837_p2 }
  0x2d   :  { %p3840_p5 = pnand %p3839_p4, %p3833_p1 }
  0x2f   :  { %3843 = shalt.err (!%p3840_p5)
}
  0x30   :  { %35 = dma.hbm_to_vmem [thread:$0]  %s4150_s0, 128, %s33_s1, [#allocation3]  }
  0x31   :  { %s3964_s27 = smov [#allocation7]   ;;  %s3965_s16 = smov [#allocation10]  }
  0x32   :  { %s55_s30 = sshll.u32 %s3964_s27, 4  ;;  %s83_s17 = sshll.u32 %s3965_s16, 4  ;;  %s56_s30 = int_to_ptr.vmem [resolvable:$true] %s55_s30  ;;  %s84_s17 = int_to_ptr.vmem [resolvable:$true] %s83_s17 }
  0x33   :  { %s3852_s20 = scalar_lea.vmem %s56_s30, 16384  ;;  %p3857_p7 = scmp.lt.s32.totalorder %s56_s30, %s56_s30 }
  0x34   :  { %p3853_p6 = scmp.ne.s32.totalorder %s56_s30, %s3852_s20  ;;  %p3858_p8 = scmp.lt.s32.totalorder %s3852_s20, %s3852_s20 }
  0x36   :  { %p3859_p9 = por %p3858_p8, %p3857_p7 }
  0x38   :  { %p3860_p10 = pnand %p3859_p9, %p3853_p6 }
  0x3a   :  { %3863 = shalt.err (!%p3860_p10)
}
  0x3b   :  { %61 = dma.hbm_to_vmem [thread:$0]  %s4153_s3, 16384, %s56_s30, [#allocation6], %s3957_s21, %s3957_s21, %s3958_s22  }
  0x3c   :  { %s3872_s0 = scalar_lea.vmem %s84_s17, 6144  ;;  %p3877_p12 = scmp.lt.s32.totalorder %s84_s17, %s84_s17 }
  0x3d   :  { %p3873_p11 = scmp.ne.s32.totalorder %s84_s17, %s3872_s0  ;;  %p3878_p13 = scmp.lt.s32.totalorder %s3872_s0, %s3872_s0 }
  0x3f   :  { %p3879_p0 = por %p3878_p13, %p3877_p12 }
  0x41   :  { %p3880_p1 = pnand %p3879_p0, %p3873_p11 }
  0x43   :  { %3883 = shalt.err (!%p3880_p1)
}
  0x44   :  { %s3966_s29 = smov 192   ;;  %s3967_s18 = smov 12  }
  0x45   :  { %89 = dma.hbm_to_vmem [thread:$0]  %s4157_s7, 6144, %s84_s17, [#allocation9], %s3966_s29, %s3966_s29, %s3967_s18  }
  0x46   :  { %s3968_s23 = smov [#allocation13]  }
  0x47   :  { %s111_s24 = sshll.u32 %s3968_s23, 4  ;;  %s112_s24 = int_to_ptr.vmem [resolvable:$true] %s111_s24 }
  0x48   :  { %s3892_s25 = scalar_lea.vmem %s112_s24, 2048  ;;  %p3897_p3 = scmp.lt.s32.totalorder %s112_s24, %s112_s24 }
  0x49   :  { %p3893_p2 = scmp.ne.s32.totalorder %s112_s24, %s3892_s25  ;;  %p3898_p4 = scmp.lt.s32.totalorder %s3892_s25, %s3892_s25 }
  0x4b   :  { %p3899_p5 = por %p3898_p4, %p3897_p3 }
  0x4d   :  { %p3900_p6 = pnand %p3899_p5, %p3893_p2 }
  0x4f   :  { %3903 = shalt.err (!%p3900_p6)
}
  0x50   :  { %s3969_s3 = smov 64   ;;  %s3970_s21 = smov 4  }
  0x51   :  { %117 = dma.hbm_to_vmem [thread:$0]  %s4161_s11, 2048, %s112_s24, [#allocation12], %s3969_s3, %s3969_s3, %s3970_s21  }
  0x52   :  { %s3971_s26 = smov [#allocation14]  }
  0x53   :  { %s125_s27 = sshll.u32 %s3971_s26, 4  ;;  %s126_s27 = int_to_ptr.vmem [resolvable:$true] %s125_s27 }
  0x54   :  { %s3912_s7 = scalar_lea.vmem %s126_s27, 1024  ;;  %p3917_p8 = scmp.lt.s32.totalorder %s126_s27, %s126_s27 }
  0x55   :  { %p3913_p7 = scmp.ne.s32.totalorder %s126_s27, %s3912_s7  ;;  %p3918_p9 = scmp.lt.s32.totalorder %s3912_s7, %s3912_s7 }
  0x57   :  { %p3919_p10 = por %p3918_p9, %p3917_p8 }
  0x59   :  { %p3920_p11 = pnand %p3919_p10, %p3913_p7 }
  0x5b   :  { %3923 = shalt.err (!%p3920_p11)
}
  0x5c   :  { %131 = dma.hbm_to_vmem [thread:$0]  %s4163_s13, 1024, %s126_s27, [#allocation15], %s3969_s3, %s3969_s3, %s3970_s21  }
  0x5d   :  { %3944 = dma.done.wait [#allocation3], 128  }
  0x5e   :  { %3945 = vsyncadd [#allocation3], 4294967168 }
  0x5f   :  { %3946 = dma.done.wait [#allocation6], 17408  }
  0x60   :  { %3947 = vsyncadd [#allocation6], 4294949888 }
  0x61   :  { %3948 = dma.done.wait [#allocation9], 14336  }
  0x62   :  { %3949 = vsyncadd [#allocation9], 4294952960 }
  0x63   :  { %3950 = dma.done.wait [#allocation12], 8192  }
  0x64   :  { %3951 = vsyncadd [#allocation12], 4294959104 }
  0x65   :  { %3952 = dma.done.wait [#allocation15], 1024  }
  0x66   :  { %3953 = vsyncadd [#allocation15], 4294966272  ;;  %v3972_v0 = vmov 0   ;;  %v3304_v1 = vld [vmem:[#allocation5 + $0x24] ss:$16 sps:$4 sm:$0xff]   ;;  %v159_v9 = vld [vmem:[#allocation2] sm:$0xff] }
  0x67   :  { %267 = vmatprep.mubr.bf16.mxu0 %v3972_v0  ;;  %308 = vmatprep.mubr.bf16.mxu1 %v3972_v0  ;;  %v3306_v2 = vld [vmem:[#allocation5 + $0x2c] ss:$16 sps:$4 sm:$0xff]   ;;  %v3308_v3 = vld [vmem:[#allocation5 + $0x20] ss:$16 sps:$4 sm:$0xff]   ;;  %v3309_v4 = vld [vmem:[#allocation5 + $0x28] ss:$16 sps:$4 sm:$0xff]   ;;  %v160_v12 = vpack.c.bf16 %v159_v9, %v159_v9 }
  0x68   :  { %247 = vmatprep.subr.bf16.mxu0 %v3304_v1  ;;  %288 = vmatprep.subr.bf16.mxu1 %v3306_v2  ;;  %v3310_v5 = vld [vmem:[#allocation5 + $0x4] ss:$16 sps:$4 sm:$0xff]   ;;  %v3312_v6 = vld [vmem:[#allocation5 + $0xc] ss:$16 sps:$4 sm:$0xff]   ;;  %v3314_v7 = vld [vmem:[#allocation5] ss:$16 sps:$4 sm:$0xff]  }
  0x69   :  { %248 = vmatpush1.bf16.msra.mxu0 %v3308_v3  ;;  %289 = vmatpush1.bf16.msra.mxu1 %v3309_v4  ;;  %v3315_v8 = vld [vmem:[#allocation5 + $0x8] ss:$16 sps:$4 sm:$0xff]   ;;  %v3316_v10 = vld [vmem:[#allocation7 + $0xe0] ss:$16 sps:$4 sm:$0xff]   ;;  %v3318_v11 = vld [vmem:[#allocation7 + $0xe4] ss:$16 sps:$4 sm:$0xff]  }
  0x6a   :  { %249 = vmatprep.subr.bf16.mxu0 %v3310_v5  ;;  %290 = vmatprep.subr.bf16.mxu1 %v3312_v6  ;;  %v3319_v13 = vld [vmem:[#allocation7 + $0x2e0] ss:$16 sps:$4 sm:$0xff]   ;;  %vm231_vm0 = vcmask 261120   ;;  %v3321_v14 = vld [vmem:[#allocation7 + $0x2e4] ss:$16 sps:$4 sm:$0xff]   ;;  %vm3974_vm1 = vmmov 0  }
  0x6b   :  { %v3324_v15 = vld [vmem:[#allocation7 + $0xc4] ss:$16 sps:$4 sm:$0xff]   ;;  %v3322_v17 = vld [vmem:[#allocation7 + $0xc0] ss:$16 sps:$4 sm:$0xff]   ;;  %s3975_s1 = smov [#allocation16]  }
  0x6c   :  { %v3327_v16 = vld [vmem:[#allocation7 + $0x2c4] ss:$16 sps:$4 sm:$0xff]   ;;  %v3325_v18 = vld [vmem:[#allocation7 + $0x2c0] ss:$16 sps:$4 sm:$0xff]   ;;  %s2874_s19 = sshll.u32 %s3975_s1, 4  ;;  %s2875_s19 = int_to_ptr.vmem [resolvable:$true] %s2874_s19 }
  0x6d   :  { %250 = vmatpush1.bf16.msra.mxu0 %v3314_v7  ;;  %291 = vmatpush1.bf16.msra.mxu1 %v3315_v8  ;;  %v3330_v19 = vld [vmem:[#allocation7 + $0xa4] ss:$16 sps:$4 sm:$0xff]   ;;  %v3328_v21 = vld [vmem:[#allocation7 + $0xa0] ss:$16 sps:$4 sm:$0xff]   ;;  %p3929_p13 = scmp.lt.s32.totalorder %s2875_s19, %s2875_s19 }
  0x6e   :  { %1115 = vmatprep.subr.bf16.mxu0 %v3318_v11  ;;  %1156 = vmatprep.subr.bf16.mxu1 %v3321_v14  ;;  %v3333_v20 = vld [vmem:[#allocation7 + $0x2a4] ss:$16 sps:$4 sm:$0xff]   ;;  %v3331_v22 = vld [vmem:[#allocation7 + $0x2a0] ss:$16 sps:$4 sm:$0xff]   ;;  %v171_v14 = vlaneseq }
  0x6f   :  { %v3336_v23 = vld [vmem:[#allocation7 + $0x84] ss:$16 sps:$4 sm:$0xff]   ;;  %v3334_v25 = vld [vmem:[#allocation7 + $0x80] ss:$16 sps:$4 sm:$0xff]  }
  0x70   :  { %2895 = vmatmul.mubr.msk.bf16.vlgmr.msra.gmra.mxu0 %vm231_vm0, %v160_v12  ;;  %2896 = vmatmul.mubr.msk.bf16.vlgmr.msra.gmra.mxu1 %vm231_vm0, %v160_v12  ;;  %v3339_v24 = vld [vmem:[#allocation7 + $0x284] ss:$16 sps:$4 sm:$0xff]   ;;  %v3337_v26 = vld [vmem:[#allocation7 + $0x280] ss:$16 sps:$4 sm:$0xff]   ;;  %v3414_v12 = vld [vmem:[#allocation7 + $0xec] ss:$16 sps:$4 sm:$0xff]  }
  0x71   :  { %1116 = vmatpush1.bf16.msra.mxu0 %v3316_v10  ;;  %1157 = vmatpush1.bf16.msra.mxu1 %v3319_v13  ;;  %v3342_v27 = vld [vmem:[#allocation7 + $0x64] ss:$16 sps:$4 sm:$0xff]   ;;  %v3340_v29 = vld [vmem:[#allocation7 + $0x60] ss:$16 sps:$4 sm:$0xff]   ;;  %v3417_v13 = vld [vmem:[#allocation7 + $0x2ec] ss:$16 sps:$4 sm:$0xff]  }
  0x72   :  { %1117 = vmatprep.subr.bf16.mxu0 %v3324_v15  ;;  %1158 = vmatprep.subr.bf16.mxu1 %v3327_v16  ;;  %v3345_v28 = vld [vmem:[#allocation7 + $0x264] ss:$16 sps:$4 sm:$0xff]   ;;  %v3343_v30 = vld [vmem:[#allocation7 + $0x260] ss:$16 sps:$4 sm:$0xff]   ;;  %v4088_v15 = vshrl.u32 %v171_v14, 7 }
  0x73   :  { %v3348_v31 = vld [vmem:[#allocation7 + $0x44] ss:$16 sps:$4 sm:$0xff]   ;;  %v3346_v33 = vld [vmem:[#allocation7 + $0x40] ss:$16 sps:$4 sm:$0xff]   ;;  %v3460_v14 = vld [vmem:[#allocation7 + $0x1e8] ss:$16 sps:$4 sm:$0xff]  }
  0x74   :  { %v3351_v32 = vld [vmem:[#allocation7 + $0x244] ss:$16 sps:$4 sm:$0xff]   ;;  %v3349_v34 = vld [vmem:[#allocation7 + $0x240] ss:$16 sps:$4 sm:$0xff]   ;;  %v4091_v16 = vsub.s32 0, %v4088_v15 }
  0x75   :  { %1118 = vmatpush1.bf16.msra.mxu0 %v3322_v17  ;;  %1159 = vmatpush1.bf16.msra.mxu1 %v3325_v18  ;;  %v3354_v35 = vld [vmem:[#allocation7 + $0x24] ss:$16 sps:$4 sm:$0xff]   ;;  %v3352_v37 = vld [vmem:[#allocation7 + $0x20] ss:$16 sps:$4 sm:$0xff]   ;;  %v4094_v17 = vsub.s32 2, %v4088_v15 }
  0x76   :  { %1119 = vmatprep.subr.bf16.mxu0 %v3330_v19  ;;  %1160 = vmatprep.subr.bf16.mxu1 %v3333_v20  ;;  %v3357_v36 = vld [vmem:[#allocation7 + $0x224] ss:$16 sps:$4 sm:$0xff]   ;;  %v3355_v38 = vld [vmem:[#allocation7 + $0x220] ss:$16 sps:$4 sm:$0xff]   ;;  %v169_v18 = vld [vmem:[%s4152_s2] sm:$0xf] }
  0x77   :  { %v3360_v39 = vld [vmem:[#allocation7 + $0x4] ss:$16 sps:$4 sm:$0xff]   ;;  %v3358_v41 = vld [vmem:[#allocation7] ss:$16 sps:$4 sm:$0xff]   ;;  %v4100_v19 = vsub.s32 1, %v4088_v15  ;;  %v185_v20 = vsub.s32 3, %v4088_v15 }
  0x78   :  { %v3363_v40 = vld [vmem:[#allocation7 + $0x204] ss:$16 sps:$4 sm:$0xff]   ;;  %v3361_v42 = vld [vmem:[#allocation7 + $0x200] ss:$16 sps:$4 sm:$0xff]  }
  0x79   :  { %1120 = vmatpush1.bf16.msra.mxu0 %v3328_v21  ;;  %1161 = vmatpush1.bf16.msra.mxu1 %v3331_v22  ;;  %v3366_v43 = vld [vmem:[#allocation7 + $0x1e4] ss:$16 sps:$4 sm:$0xff]   ;;  %v3364_v45 = vld [vmem:[#allocation7 + $0x1e0] ss:$16 sps:$4 sm:$0xff]   ;;  %v174_v21 = vrot.slane %v169_v18, %v4091_v16  ;;  %v182_v22 = vrot.slane %v169_v18, %v4094_v17 }
  0x7a   :  { %1121 = vmatprep.subr.bf16.mxu0 %v3336_v23  ;;  %1162 = vmatprep.subr.bf16.mxu1 %v3339_v24  ;;  %v3369_v44 = vld [vmem:[#allocation7 + $0x3e4] ss:$16 sps:$4 sm:$0xff]   ;;  %v3367_v46 = vld [vmem:[#allocation7 + $0x3e0] ss:$16 sps:$4 sm:$0xff]   ;;  %v178_v23 = vrot.slane %v169_v18, %v4100_v19  ;;  %v186_v24 = vrot.slane %v169_v18, %v185_v20  ;;  %v3463_v18 = vld [vmem:[#allocation7 + $0x3e8] ss:$16 sps:$4 sm:$0xff]  }
  0x7b   :  { %v3372_v47 = vld [vmem:[#allocation7 + $0x1c4] ss:$16 sps:$4 sm:$0xff]   ;;  %v3370_v49 = vld [vmem:[#allocation7 + $0x1c0] ss:$16 sps:$4 sm:$0xff]  }
  0x7c   :  { %v3375_v48 = vld [vmem:[#allocation7 + $0x3c4] ss:$16 sps:$4 sm:$0xff]   ;;  %v3373_v50 = vld [vmem:[#allocation7 + $0x3c0] ss:$16 sps:$4 sm:$0xff]  }
  0x7d   :  { %1122 = vmatpush1.bf16.msra.mxu0 %v3334_v25  ;;  %1163 = vmatpush1.bf16.msra.mxu1 %v3337_v26  ;;  %v3378_v51 = vld [vmem:[#allocation7 + $0x1a4] ss:$16 sps:$4 sm:$0xff]   ;;  %v3376_v53 = vld [vmem:[#allocation7 + $0x1a0] ss:$16 sps:$4 sm:$0xff]  }
  0x7e   :  { %1123 = vmatprep.subr.bf16.mxu0 %v3342_v27  ;;  %1164 = vmatprep.subr.bf16.mxu1 %v3345_v28  ;;  %v3381_v52 = vld [vmem:[#allocation7 + $0x3a4] ss:$16 sps:$4 sm:$0xff]   ;;  %v3379_v54 = vld [vmem:[#allocation7 + $0x3a0] ss:$16 sps:$4 sm:$0xff]  }
  0x7f   :  { %v3384_v55 = vld [vmem:[#allocation7 + $0x184] ss:$16 sps:$4 sm:$0xff]   ;;  %v3382_v57 = vld [vmem:[#allocation7 + $0x180] ss:$16 sps:$4 sm:$0xff]  }
  0x80   :  { %v3387_v56 = vld [vmem:[#allocation7 + $0x384] ss:$16 sps:$4 sm:$0xff]   ;;  %v3385_v58 = vld [vmem:[#allocation7 + $0x380] ss:$16 sps:$4 sm:$0xff]  }
  0x81   :  { %1124 = vmatpush1.bf16.msra.mxu0 %v3340_v29  ;;  %1165 = vmatpush1.bf16.msra.mxu1 %v3343_v30  ;;  %v3390_v59 = vld [vmem:[#allocation7 + $0x164] ss:$16 sps:$4 sm:$0xff]   ;;  %v3388_v61 = vld [vmem:[#allocation7 + $0x160] ss:$16 sps:$4 sm:$0xff]  }
  0x82   :  { %1125 = vmatprep.subr.bf16.mxu0 %v3348_v31  ;;  %1166 = vmatprep.subr.bf16.mxu1 %v3351_v32  ;;  %v3393_v60 = vld [vmem:[#allocation7 + $0x364] ss:$16 sps:$4 sm:$0xff]   ;;  %v3391_v62 = vld [vmem:[#allocation7 + $0x360] ss:$16 sps:$4 sm:$0xff]  }
  0x83   :  { %v3396_v63 = vld [vmem:[#allocation7 + $0x144] ss:$16 sps:$4 sm:$0xff]   ;;  %v3394_v2 = vld [vmem:[#allocation7 + $0x140] ss:$16 sps:$4 sm:$0xff]  }
  0x84   :  { %v3399_v1 = vld [vmem:[#allocation7 + $0x344] ss:$16 sps:$4 sm:$0xff]   ;;  %v3397_v3 = vld [vmem:[#allocation7 + $0x340] ss:$16 sps:$4 sm:$0xff]  }
  0x85   :  { %1126 = vmatpush1.bf16.msra.mxu0 %v3346_v33  ;;  %1167 = vmatpush1.bf16.msra.mxu1 %v3349_v34  ;;  %v3402_v4 = vld [vmem:[#allocation7 + $0x124] ss:$16 sps:$4 sm:$0xff]   ;;  %v3400_v6 = vld [vmem:[#allocation7 + $0x120] ss:$16 sps:$4 sm:$0xff]  }
  0x86   :  { %1127 = vmatprep.subr.bf16.mxu0 %v3354_v35  ;;  %1168 = vmatprep.subr.bf16.mxu1 %v3357_v36  ;;  %v3405_v5 = vld [vmem:[#allocation7 + $0x324] ss:$16 sps:$4 sm:$0xff]   ;;  %v3403_v7 = vld [vmem:[#allocation7 + $0x320] ss:$16 sps:$4 sm:$0xff]  }
  0x87   :  { %v3408_v8 = vld [vmem:[#allocation7 + $0x104] ss:$16 sps:$4 sm:$0xff]   ;;  %v3406_v10 = vld [vmem:[#allocation7 + $0x100] ss:$16 sps:$4 sm:$0xff]  }
  0x88   :  { %v3411_v9 = vld [vmem:[#allocation7 + $0x304] ss:$16 sps:$4 sm:$0xff]   ;;  %v3409_v11 = vld [vmem:[#allocation7 + $0x300] ss:$16 sps:$4 sm:$0xff]  }
  0x89   :  { %1128 = vmatpush1.bf16.msra.mxu0 %v3352_v37  ;;  %1169 = vmatpush1.bf16.msra.mxu1 %v3355_v38  ;;  %v3604_v15 = vld [vmem:[#allocation10 + $0xa8] ss:$12 sps:$4 sm:$0xff]  }
  0x8a   :  { %1129 = vmatprep.subr.bf16.mxu0 %v3360_v39  ;;  %1170 = vmatprep.subr.bf16.mxu1 %v3363_v40 }
  0x8d   :  { %1130 = vmatpush1.bf16.msra.mxu0 %v3358_v41  ;;  %1171 = vmatpush1.bf16.msra.mxu1 %v3361_v42 }
  0x8e   :  { %1131 = vmatprep.subr.bf16.mxu0 %v3366_v43  ;;  %1172 = vmatprep.subr.bf16.mxu1 %v3369_v44  ;;  %v3412_v44 = vld [vmem:[#allocation7 + $0xe8] ss:$16 sps:$4 sm:$0xff]  }
  0x91   :  { %1132 = vmatpush2.bf16.msra.mxu0 %v3364_v45  ;;  %1173 = vmatpush2.bf16.msra.mxu1 %v3367_v46  ;;  %v3415_v45 = vld [vmem:[#allocation7 + $0x2e8] ss:$16 sps:$4 sm:$0xff]  }
  0x92   :  { %1133 = vmatprep.subr.bf16.mxu0 %v3372_v47  ;;  %1174 = vmatprep.subr.bf16.mxu1 %v3375_v48  ;;  %v3420_v47 = vld [vmem:[#allocation7 + $0xcc] ss:$16 sps:$4 sm:$0xff]  }
  0x93   :  { %v3423_v48 = vld [vmem:[#allocation7 + $0x2cc] ss:$16 sps:$4 sm:$0xff]  }
  0x95   :  { %1134 = vmatpush2.bf16.msra.mxu0 %v3370_v49  ;;  %1175 = vmatpush2.bf16.msra.mxu1 %v3373_v50  ;;  %v3418_v49 = vld [vmem:[#allocation7 + $0xc8] ss:$16 sps:$4 sm:$0xff]  }
  0x96   :  { %1135 = vmatprep.subr.bf16.mxu0 %v3378_v51  ;;  %1176 = vmatprep.subr.bf16.mxu1 %v3381_v52  ;;  %v3421_v50 = vld [vmem:[#allocation7 + $0x2c8] ss:$16 sps:$4 sm:$0xff]   ;;  %v3426_v51 = vld [vmem:[#allocation7 + $0xac] ss:$16 sps:$4 sm:$0xff]  }
  0x97   :  { %v3429_v52 = vld [vmem:[#allocation7 + $0x2ac] ss:$16 sps:$4 sm:$0xff]  }
  0x99   :  { %1136 = vmatpush2.bf16.msra.mxu0 %v3376_v53  ;;  %1177 = vmatpush2.bf16.msra.mxu1 %v3379_v54  ;;  %v3424_v53 = vld [vmem:[#allocation7 + $0xa8] ss:$16 sps:$4 sm:$0xff]  }
  0x9a   :  { %1137 = vmatprep.subr.bf16.mxu0 %v3384_v55  ;;  %1178 = vmatprep.subr.bf16.mxu1 %v3387_v56  ;;  %v3427_v54 = vld [vmem:[#allocation7 + $0x2a8] ss:$16 sps:$4 sm:$0xff]   ;;  %v3432_v55 = vld [vmem:[#allocation7 + $0x8c] ss:$16 sps:$4 sm:$0xff]  }
  0x9b   :  { %v3435_v56 = vld [vmem:[#allocation7 + $0x28c] ss:$16 sps:$4 sm:$0xff]  }
  0x9d   :  { %1138 = vmatpush2.bf16.msra.mxu0 %v3382_v57  ;;  %1179 = vmatpush2.bf16.msra.mxu1 %v3385_v58  ;;  %v3430_v57 = vld [vmem:[#allocation7 + $0x88] ss:$16 sps:$4 sm:$0xff]  }
  0x9e   :  { %1139 = vmatprep.subr.bf16.mxu0 %v3390_v59  ;;  %1180 = vmatprep.subr.bf16.mxu1 %v3393_v60  ;;  %v3433_v58 = vld [vmem:[#allocation7 + $0x288] ss:$16 sps:$4 sm:$0xff]   ;;  %v3438_v59 = vld [vmem:[#allocation7 + $0x6c] ss:$16 sps:$4 sm:$0xff]  }
  0x9f   :  { %v3441_v60 = vld [vmem:[#allocation7 + $0x26c] ss:$16 sps:$4 sm:$0xff]  }
  0xa1   :  { %1140 = vmatpush2.bf16.msra.mxu0 %v3388_v61  ;;  %1181 = vmatpush2.bf16.msra.mxu1 %v3391_v62  ;;  %v3436_v61 = vld [vmem:[#allocation7 + $0x68] ss:$16 sps:$4 sm:$0xff]  }
  0xa2   :  { %1141 = vmatprep.subr.bf16.mxu0 %v3396_v63  ;;  %1182 = vmatprep.subr.bf16.mxu1 %v3399_v1  ;;  %v3439_v62 = vld [vmem:[#allocation7 + $0x268] ss:$16 sps:$4 sm:$0xff]   ;;  %v3444_v63 = vld [vmem:[#allocation7 + $0x4c] ss:$16 sps:$4 sm:$0xff]  }
  0xa3   :  { %v3447_v1 = vld [vmem:[#allocation7 + $0x24c] ss:$16 sps:$4 sm:$0xff]  }
  0xa5   :  { %1142 = vmatpush2.bf16.msra.mxu0 %v3394_v2  ;;  %1183 = vmatpush2.bf16.msra.mxu1 %v3397_v3  ;;  %v3442_v2 = vld [vmem:[#allocation7 + $0x48] ss:$16 sps:$4 sm:$0xff]  }
  0xa6   :  { %1143 = vmatprep.subr.bf16.mxu0 %v3402_v4  ;;  %1184 = vmatprep.subr.bf16.mxu1 %v3405_v5  ;;  %v3445_v3 = vld [vmem:[#allocation7 + $0x248] ss:$16 sps:$4 sm:$0xff]   ;;  %v3450_v4 = vld [vmem:[#allocation7 + $0x2c] ss:$16 sps:$4 sm:$0xff]  }
  0xa7   :  { %v3453_v5 = vld [vmem:[#allocation7 + $0x22c] ss:$16 sps:$4 sm:$0xff]  }
  0xa9   :  { %1144 = vmatpush2.bf16.msra.mxu0 %v3400_v6  ;;  %1185 = vmatpush2.bf16.msra.mxu1 %v3403_v7  ;;  %v3448_v6 = vld [vmem:[#allocation7 + $0x28] ss:$16 sps:$4 sm:$0xff]  }
  0xaa   :  { %1145 = vmatprep.subr.bf16.mxu0 %v3408_v8  ;;  %1186 = vmatprep.subr.bf16.mxu1 %v3411_v9  ;;  %v3451_v7 = vld [vmem:[#allocation7 + $0x228] ss:$16 sps:$4 sm:$0xff]   ;;  %v3456_v8 = vld [vmem:[#allocation7 + $0xc] ss:$16 sps:$4 sm:$0xff]  }
  0xab   :  { %v3459_v9 = vld [vmem:[#allocation7 + $0x20c] ss:$16 sps:$4 sm:$0xff]  }
  0xad   :  { %1146 = vmatpush2.bf16.msra.mxu0 %v3406_v10  ;;  %1187 = vmatpush2.bf16.msra.mxu1 %v3409_v11  ;;  %v3454_v10 = vld [vmem:[#allocation7 + $0x8] ss:$16 sps:$4 sm:$0xff]  }
  0xae   :  { %1197 = vmatprep.subr.bf16.mxu0 %v3414_v12  ;;  %1238 = vmatprep.subr.bf16.mxu1 %v3417_v13  ;;  %v3457_v11 = vld [vmem:[#allocation7 + $0x208] ss:$16 sps:$4 sm:$0xff]   ;;  %v3462_v12 = vld [vmem:[#allocation7 + $0x1ec] ss:$16 sps:$4 sm:$0xff]  }
  0xaf   :  { %v3465_v13 = vld [vmem:[#allocation7 + $0x3ec] ss:$16 sps:$4 sm:$0xff]  }
 0x130   :  { %v269_v25 = vpop.f32.mrf.mxu0  ;;  %v310_v26 = vpop.f32.mrf.mxu1 }
 0x131   :  { %v270_v27 = vadd.f32 %v269_v25, %v174_v21  ;;  %v311_v28 = vadd.f32 %v310_v26, %v182_v22  ;;  %v3468_v21 = vld [vmem:[#allocation7 + $0x1cc] ss:$16 sps:$4 sm:$0xff]  }
 0x132   :  { %v271_v29 = vpop.f32.mrf.mxu0  ;;  %v312_v30 = vpop.f32.mrf.mxu1  ;;  %v3471_v22 = vld [vmem:[#allocation7 + $0x3cc] ss:$16 sps:$4 sm:$0xff]  }
 0x133   :  { %v319_v31 = vmax.f32 %v311_v28, 0.0  ;;  %v272_v32 = vadd.f32 %v271_v29, %v178_v23  ;;  %v313_v33 = vadd.f32 %v312_v30, %v186_v24  ;;  %v317_v34 = vmax.f32 %v270_v27, 0.0  ;;  %v3466_v23 = vld [vmem:[#allocation7 + $0x1c8] ss:$16 sps:$4 sm:$0xff]   ;;  %v3474_v25 = vld [vmem:[#allocation7 + $0x1ac] ss:$16 sps:$4 sm:$0xff]  }
 0x134   :  { %v273_v35 = vpop.f32.mrf.mxu0  ;;  %v314_v36 = vpop.f32.mrf.mxu1  ;;  %v3469_v24 = vld [vmem:[#allocation7 + $0x3c8] ss:$16 sps:$4 sm:$0xff]   ;;  %v3477_v26 = vld [vmem:[#allocation7 + $0x3ac] ss:$16 sps:$4 sm:$0xff]  }
 0x135   :  { %v318_v37 = vmax.f32 %v272_v32, 0.0  ;;  %v320_v38 = vmax.f32 %v313_v33, 0.0  ;;  %v4108_v39 = vpack.c.bf16 %v319_v31, %v319_v31  ;;  %v4110_v46 = vpack.c.bf16 %v317_v34, %v317_v34  ;;  %v3472_v27 = vld [vmem:[#allocation7 + $0x1a8] ss:$16 sps:$4 sm:$0xff]   ;;  %v3480_v29 = vld [vmem:[#allocation7 + $0x18c] ss:$16 sps:$4 sm:$0xff]  }
 0x136   :  { %v274_v40 = vpop.f32.mrf.mxu0  ;;  %v315_v41 = vpop.f32.mrf.mxu1  ;;  %v3475_v28 = vld [vmem:[#allocation7 + $0x3a8] ss:$16 sps:$4 sm:$0xff]   ;;  %v3483_v30 = vld [vmem:[#allocation7 + $0x38c] ss:$16 sps:$4 sm:$0xff]  }
 0x137   :  { %v322_v42 = vpack.c.bf16 %v318_v37, %v318_v37  ;;  %v324_v43 = vpack.c.bf16 %v320_v38, %v320_v38  ;;  %v3478_v31 = vld [vmem:[#allocation7 + $0x188] ss:$16 sps:$4 sm:$0xff]   ;;  %v3486_v33 = vld [vmem:[#allocation7 + $0x16c] ss:$16 sps:$4 sm:$0xff]  }
 0x138   :  { %v3481_v32 = vld [vmem:[#allocation7 + $0x388] ss:$16 sps:$4 sm:$0xff]   ;;  %v3489_v34 = vld [vmem:[#allocation7 + $0x36c] ss:$16 sps:$4 sm:$0xff]  }
 0x139   :  { %1147 = vmatprep.mubr.bf16.mxu0 %v322_v42  ;;  %1188 = vmatprep.mubr.bf16.mxu1 %v324_v43  ;;  %v3484_v35 = vld [vmem:[#allocation7 + $0x168] ss:$16 sps:$4 sm:$0xff]   ;;  %v3492_v37 = vld [vmem:[#allocation7 + $0x14c] ss:$16 sps:$4 sm:$0xff]  }
 0x13a   :  { %1148 = vmatmul.mubr.bf16.vlgmr.msra.gmra.mxu0 %v4110_v46  ;;  %1189 = vmatmul.mubr.bf16.vlgmr.msra.gmra.mxu1 %v4108_v39  ;;  %v3487_v36 = vld [vmem:[#allocation7 + $0x368] ss:$16 sps:$4 sm:$0xff]   ;;  %v3495_v38 = vld [vmem:[#allocation7 + $0x34c] ss:$16 sps:$4 sm:$0xff]  }
 0x13b   :  { %1198 = vmatpush1.bf16.msra.mxu0 %v3412_v44  ;;  %1239 = vmatpush1.bf16.msra.mxu1 %v3415_v45  ;;  %v3490_v40 = vld [vmem:[#allocation7 + $0x148] ss:$16 sps:$4 sm:$0xff]  }
 0x13c   :  { %1229 = vmatprep.mubr.bf16.mxu0 %v322_v42  ;;  %1270 = vmatprep.mubr.bf16.mxu1 %v324_v43  ;;  %v3493_v41 = vld [vmem:[#allocation7 + $0x348] ss:$16 sps:$4 sm:$0xff]   ;;  %v3498_v42 = vld [vmem:[#allocation7 + $0x12c] ss:$16 sps:$4 sm:$0xff]  }
 0x13d   :  { %1199 = vmatprep.subr.bf16.mxu0 %v3420_v47  ;;  %1240 = vmatprep.subr.bf16.mxu1 %v3423_v48  ;;  %v3501_v43 = vld [vmem:[#allocation7 + $0x32c] ss:$16 sps:$4 sm:$0xff]   ;;  %v3496_v44 = vld [vmem:[#allocation7 + $0x128] ss:$16 sps:$4 sm:$0xff]  }
 0x13e   :  { %v3499_v45 = vld [vmem:[#allocation7 + $0x328] ss:$16 sps:$4 sm:$0xff]   ;;  %v3504_v47 = vld [vmem:[#allocation7 + $0x10c] ss:$16 sps:$4 sm:$0xff]  }
 0x13f   :  { %1200 = vmatpush1.bf16.msra.mxu0 %v3418_v49  ;;  %1241 = vmatpush1.bf16.msra.mxu1 %v3421_v50  ;;  %v3507_v48 = vld [vmem:[#allocation7 + $0x30c] ss:$16 sps:$4 sm:$0xff]   ;;  %v3502_v49 = vld [vmem:[#allocation7 + $0x108] ss:$16 sps:$4 sm:$0xff]  }
 0x140   :  { %1201 = vmatprep.subr.bf16.mxu0 %v3426_v51  ;;  %1242 = vmatprep.subr.bf16.mxu1 %v3429_v52  ;;  %v3505_v50 = vld [vmem:[#allocation7 + $0x308] ss:$16 sps:$4 sm:$0xff]   ;;  %v3510_v51 = vld [vmem:[#allocation8 + $0x74] ss:$8 sps:$4 sm:$0xff]  }
 0x141   :  { %v3508_v52 = vld [vmem:[#allocation8 + $0x70] ss:$8 sps:$4 sm:$0xff]  }
 0x143   :  { %1202 = vmatpush1.bf16.msra.mxu0 %v3424_v53  ;;  %1243 = vmatpush1.bf16.msra.mxu1 %v3427_v54  ;;  %v3513_v53 = vld [vmem:[#allocation8 + $0x64] ss:$8 sps:$4 sm:$0xff]   ;;  %v3511_v54 = vld [vmem:[#allocation8 + $0x60] ss:$8 sps:$4 sm:$0xff]  }
 0x144   :  { %1203 = vmatprep.subr.bf16.mxu0 %v3432_v55  ;;  %1244 = vmatprep.subr.bf16.mxu1 %v3435_v56  ;;  %v3516_v55 = vld [vmem:[#allocation8 + $0x54] ss:$8 sps:$4 sm:$0xff]   ;;  %v3514_v56 = vld [vmem:[#allocation8 + $0x50] ss:$8 sps:$4 sm:$0xff]  }
 0x147   :  { %1204 = vmatpush1.bf16.msra.mxu0 %v3430_v57  ;;  %1245 = vmatpush1.bf16.msra.mxu1 %v3433_v58  ;;  %v3519_v57 = vld [vmem:[#allocation8 + $0x44] ss:$8 sps:$4 sm:$0xff]   ;;  %v3517_v58 = vld [vmem:[#allocation8 + $0x40] ss:$8 sps:$4 sm:$0xff]  }
 0x148   :  { %1205 = vmatprep.subr.bf16.mxu0 %v3438_v59  ;;  %1246 = vmatprep.subr.bf16.mxu1 %v3441_v60  ;;  %v3522_v59 = vld [vmem:[#allocation8 + $0x34] ss:$8 sps:$4 sm:$0xff]  }
 0x149   :  { %v3558_v60 = vld [vmem:[#allocation8 + $0x174] ss:$8 sps:$4 sm:$0xff]  }
 0x14b   :  { %1206 = vmatpush1.bf16.msra.mxu0 %v3436_v61  ;;  %1247 = vmatpush1.bf16.msra.mxu1 %v3439_v62  ;;  %v3556_v61 = vld [vmem:[#allocation8 + $0x170] ss:$8 sps:$4 sm:$0xff]   ;;  %v3561_v62 = vld [vmem:[#allocation8 + $0x164] ss:$8 sps:$4 sm:$0xff]  }
 0x14c   :  { %1207 = vmatprep.subr.bf16.mxu0 %v3444_v63  ;;  %1248 = vmatprep.subr.bf16.mxu1 %v3447_v1  ;;  %v3525_v63 = vld [vmem:[#allocation8 + $0x24] ss:$8 sps:$4 sm:$0xff]   ;;  %v3564_v1 = vld [vmem:[#allocation8 + $0x154] ss:$8 sps:$4 sm:$0xff]  }
 0x14f   :  { %1208 = vmatpush1.bf16.msra.mxu0 %v3442_v2  ;;  %1249 = vmatpush1.bf16.msra.mxu1 %v3445_v3  ;;  %v3523_v2 = vld [vmem:[#allocation8 + $0x20] ss:$8 sps:$4 sm:$0xff]   ;;  %v3562_v3 = vld [vmem:[#allocation8 + $0x150] ss:$8 sps:$4 sm:$0xff]  }
 0x150   :  { %1209 = vmatprep.subr.bf16.mxu0 %v3450_v4  ;;  %1250 = vmatprep.subr.bf16.mxu1 %v3453_v5  ;;  %v3528_v4 = vld [vmem:[#allocation8 + $0x14] ss:$8 sps:$4 sm:$0xff]   ;;  %v3567_v5 = vld [vmem:[#allocation8 + $0x144] ss:$8 sps:$4 sm:$0xff]  }
 0x153   :  { %1210 = vmatpush1.bf16.msra.mxu0 %v3448_v6  ;;  %1251 = vmatpush1.bf16.msra.mxu1 %v3451_v7  ;;  %v3526_v6 = vld [vmem:[#allocation8 + $0x10] ss:$8 sps:$4 sm:$0xff]   ;;  %v3565_v7 = vld [vmem:[#allocation8 + $0x140] ss:$8 sps:$4 sm:$0xff]  }
 0x154   :  { %1211 = vmatprep.subr.bf16.mxu0 %v3456_v8  ;;  %1252 = vmatprep.subr.bf16.mxu1 %v3459_v9  ;;  %v3531_v8 = vld [vmem:[#allocation8 + $0x4] ss:$8 sps:$4 sm:$0xff]   ;;  %v3570_v9 = vld [vmem:[#allocation8 + $0x134] ss:$8 sps:$4 sm:$0xff]  }
 0x157   :  { %1212 = vmatpush1.bf16.msra.mxu0 %v3454_v10  ;;  %1253 = vmatpush1.bf16.msra.mxu1 %v3457_v11  ;;  %v3529_v10 = vld [vmem:[#allocation8] ss:$8 sps:$4 sm:$0xff]   ;;  %v3568_v11 = vld [vmem:[#allocation8 + $0x130] ss:$8 sps:$4 sm:$0xff]  }
 0x158   :  { %1213 = vmatprep.subr.bf16.mxu0 %v3462_v12  ;;  %1254 = vmatprep.subr.bf16.mxu1 %v3465_v13  ;;  %v3534_v12 = vld [vmem:[#allocation8 + $0xf4] ss:$8 sps:$4 sm:$0xff]   ;;  %v3573_v13 = vld [vmem:[#allocation8 + $0x124] ss:$8 sps:$4 sm:$0xff]  }
 0x15b   :  { %1214 = vmatpush2.bf16.msra.mxu0 %v3460_v14  ;;  %1255 = vmatpush2.bf16.msra.mxu1 %v3463_v18  ;;  %v3532_v14 = vld [vmem:[#allocation8 + $0xf0] ss:$8 sps:$4 sm:$0xff]   ;;  %v3571_v18 = vld [vmem:[#allocation8 + $0x120] ss:$8 sps:$4 sm:$0xff]  }
 0x15c   :  { %1215 = vmatprep.subr.bf16.mxu0 %v3468_v21  ;;  %1256 = vmatprep.subr.bf16.mxu1 %v3471_v22  ;;  %v3537_v21 = vld [vmem:[#allocation8 + $0xe4] ss:$8 sps:$4 sm:$0xff]   ;;  %v3576_v22 = vld [vmem:[#allocation8 + $0x114] ss:$8 sps:$4 sm:$0xff]  }
 0x15f   :  { %1216 = vmatpush2.bf16.msra.mxu0 %v3466_v23  ;;  %1257 = vmatpush2.bf16.msra.mxu1 %v3469_v24  ;;  %v3535_v23 = vld [vmem:[#allocation8 + $0xe0] ss:$8 sps:$4 sm:$0xff]   ;;  %v3574_v24 = vld [vmem:[#allocation8 + $0x110] ss:$8 sps:$4 sm:$0xff]  }
 0x160   :  { %1217 = vmatprep.subr.bf16.mxu0 %v3474_v25  ;;  %1258 = vmatprep.subr.bf16.mxu1 %v3477_v26  ;;  %v3540_v25 = vld [vmem:[#allocation8 + $0xd4] ss:$8 sps:$4 sm:$0xff]   ;;  %v3579_v26 = vld [vmem:[#allocation8 + $0x104] ss:$8 sps:$4 sm:$0xff]  }
 0x163   :  { %1218 = vmatpush2.bf16.msra.mxu0 %v3472_v27  ;;  %1259 = vmatpush2.bf16.msra.mxu1 %v3475_v28  ;;  %v3538_v27 = vld [vmem:[#allocation8 + $0xd0] ss:$8 sps:$4 sm:$0xff]   ;;  %v3577_v28 = vld [vmem:[#allocation8 + $0x100] ss:$8 sps:$4 sm:$0xff]  }
 0x164   :  { %1219 = vmatprep.subr.bf16.mxu0 %v3480_v29  ;;  %1260 = vmatprep.subr.bf16.mxu1 %v3483_v30  ;;  %v3543_v29 = vld [vmem:[#allocation8 + $0xc4] ss:$8 sps:$4 sm:$0xff]   ;;  %v3582_v30 = vld [vmem:[#allocation8 + $0x1f4] ss:$8 sps:$4 sm:$0xff]  }
 0x167   :  { %1220 = vmatpush2.bf16.msra.mxu0 %v3478_v31  ;;  %1261 = vmatpush2.bf16.msra.mxu1 %v3481_v32  ;;  %v3541_v31 = vld [vmem:[#allocation8 + $0xc0] ss:$8 sps:$4 sm:$0xff]   ;;  %v3580_v32 = vld [vmem:[#allocation8 + $0x1f0] ss:$8 sps:$4 sm:$0xff]  }
 0x168   :  { %1221 = vmatprep.subr.bf16.mxu0 %v3486_v33  ;;  %1262 = vmatprep.subr.bf16.mxu1 %v3489_v34  ;;  %v3546_v33 = vld [vmem:[#allocation8 + $0xb4] ss:$8 sps:$4 sm:$0xff]   ;;  %v3585_v34 = vld [vmem:[#allocation8 + $0x1e4] ss:$8 sps:$4 sm:$0xff]  }
 0x16b   :  { %1222 = vmatpush2.bf16.msra.mxu0 %v3484_v35  ;;  %1263 = vmatpush2.bf16.msra.mxu1 %v3487_v36  ;;  %v3544_v35 = vld [vmem:[#allocation8 + $0xb0] ss:$8 sps:$4 sm:$0xff]   ;;  %v3583_v36 = vld [vmem:[#allocation8 + $0x1e0] ss:$8 sps:$4 sm:$0xff]  }
 0x16c   :  { %1223 = vmatprep.subr.bf16.mxu0 %v3492_v37  ;;  %1264 = vmatprep.subr.bf16.mxu1 %v3495_v38  ;;  %v3549_v37 = vld [vmem:[#allocation8 + $0xa4] ss:$8 sps:$4 sm:$0xff]   ;;  %v3588_v38 = vld [vmem:[#allocation8 + $0x1d4] ss:$8 sps:$4 sm:$0xff]  }
 0x16f   :  { %1224 = vmatpush2.bf16.msra.mxu0 %v3490_v40  ;;  %1265 = vmatpush2.bf16.msra.mxu1 %v3493_v41  ;;  %v3547_v40 = vld [vmem:[#allocation8 + $0xa0] ss:$8 sps:$4 sm:$0xff]   ;;  %v3586_v41 = vld [vmem:[#allocation8 + $0x1d0] ss:$8 sps:$4 sm:$0xff]  }
 0x170   :  { %1225 = vmatprep.subr.bf16.mxu0 %v3498_v42  ;;  %1266 = vmatprep.subr.bf16.mxu1 %v3501_v43  ;;  %v3552_v42 = vld [vmem:[#allocation8 + $0x94] ss:$8 sps:$4 sm:$0xff]   ;;  %v3591_v43 = vld [vmem:[#allocation8 + $0x1c4] ss:$8 sps:$4 sm:$0xff]  }
 0x173   :  { %1226 = vmatpush2.bf16.msra.mxu0 %v3496_v44  ;;  %1267 = vmatpush2.bf16.msra.mxu1 %v3499_v45  ;;  %v3550_v44 = vld [vmem:[#allocation8 + $0x90] ss:$8 sps:$4 sm:$0xff]   ;;  %v3589_v45 = vld [vmem:[#allocation8 + $0x1c0] ss:$8 sps:$4 sm:$0xff]  }
 0x174   :  { %1227 = vmatprep.subr.bf16.mxu0 %v3504_v47  ;;  %1268 = vmatprep.subr.bf16.mxu1 %v3507_v48  ;;  %v3555_v47 = vld [vmem:[#allocation8 + $0x84] ss:$8 sps:$4 sm:$0xff]   ;;  %v3594_v48 = vld [vmem:[#allocation8 + $0x1b4] ss:$8 sps:$4 sm:$0xff]  }
 0x177   :  { %1228 = vmatpush2.bf16.msra.mxu0 %v3502_v49  ;;  %1269 = vmatpush2.bf16.msra.mxu1 %v3505_v50  ;;  %v3553_v49 = vld [vmem:[#allocation8 + $0x80] ss:$8 sps:$4 sm:$0xff]   ;;  %v3592_v50 = vld [vmem:[#allocation8 + $0x1b0] ss:$8 sps:$4 sm:$0xff]  }
 0x178   :  { %1683 = vmatprep.subr.bf16.mxu0 %v3510_v51  ;;  %1724 = vmatprep.subr.bf16.mxu1 %v3558_v60  ;;  %v3597_v51 = vld [vmem:[#allocation8 + $0x1a4] ss:$8 sps:$4 sm:$0xff]  }
 0x17a   :  { %1230 = vmatmul.mubr.bf16.vlgmr.msra.gmra.mxu0 %v4110_v46  ;;  %1271 = vmatmul.mubr.bf16.vlgmr.msra.gmra.mxu1 %v4108_v39  ;;  %v3520_v46 = vld [vmem:[#allocation8 + $0x30] ss:$8 sps:$4 sm:$0xff]   ;;  %v3559_v39 = vld [vmem:[#allocation8 + $0x160] ss:$8 sps:$4 sm:$0xff]  }
 0x17b   :  { %1684 = vmatpush1.bf16.msra.mxu0 %v3508_v52  ;;  %1725 = vmatpush1.bf16.msra.mxu1 %v3556_v61  ;;  %v3595_v52 = vld [vmem:[#allocation8 + $0x1a0] ss:$8 sps:$4 sm:$0xff]  }
 0x17c   :  { %1685 = vmatprep.subr.bf16.mxu0 %v3513_v53  ;;  %1726 = vmatprep.subr.bf16.mxu1 %v3561_v62  ;;  %v3600_v53 = vld [vmem:[#allocation8 + $0x194] ss:$8 sps:$4 sm:$0xff]  }
 0x17f   :  { %1686 = vmatpush1.bf16.msra.mxu0 %v3511_v54  ;;  %1727 = vmatpush1.bf16.msra.mxu1 %v3559_v39  ;;  %v3598_v54 = vld [vmem:[#allocation8 + $0x190] ss:$8 sps:$4 sm:$0xff]  }
 0x180   :  { %1687 = vmatprep.subr.bf16.mxu0 %v3516_v55  ;;  %1728 = vmatprep.subr.bf16.mxu1 %v3564_v1  ;;  %v3603_v55 = vld [vmem:[#allocation8 + $0x184] ss:$8 sps:$4 sm:$0xff]  }
 0x183   :  { %1688 = vmatpush1.bf16.msra.mxu0 %v3514_v56  ;;  %1729 = vmatpush1.bf16.msra.mxu1 %v3562_v3  ;;  %v3601_v56 = vld [vmem:[#allocation8 + $0x180] ss:$8 sps:$4 sm:$0xff]  }
 0x184   :  { %1689 = vmatprep.subr.bf16.mxu0 %v3519_v57  ;;  %1730 = vmatprep.subr.bf16.mxu1 %v3567_v5  ;;  %v453_v57 = vld [vmem:[%s4154_s4] sm:$0xf] }
 0x187   :  { %1690 = vmatpush1.bf16.msra.mxu0 %v3517_v58  ;;  %1731 = vmatpush1.bf16.msra.mxu1 %v3565_v7  ;;  %v458_v58 = vrot.slane %v453_v57, %v4091_v16 }
 0x188   :  { %1691 = vmatprep.subr.bf16.mxu0 %v3522_v59  ;;  %1732 = vmatprep.subr.bf16.mxu1 %v3570_v9  ;;  %v462_v59 = vrot.slane %v453_v57, %v4100_v19 }
 0x18b   :  { %1692 = vmatpush1.bf16.msra.mxu0 %v3520_v46  ;;  %1733 = vmatpush1.bf16.msra.mxu1 %v3568_v11  ;;  %v466_v11 = vrot.slane %v453_v57, %v4094_v17 }
 0x18c   :  { %1693 = vmatprep.subr.bf16.mxu0 %v3525_v63  ;;  %1734 = vmatprep.subr.bf16.mxu1 %v3573_v13 }
 0x18f   :  { %1694 = vmatpush1.bf16.msra.mxu0 %v3523_v2  ;;  %1735 = vmatpush1.bf16.msra.mxu1 %v3571_v18 }
 0x190   :  { %1695 = vmatprep.subr.bf16.mxu0 %v3528_v4  ;;  %1736 = vmatprep.subr.bf16.mxu1 %v3576_v22 }
 0x193   :  { %1696 = vmatpush1.bf16.msra.mxu0 %v3526_v6  ;;  %1737 = vmatpush1.bf16.msra.mxu1 %v3574_v24 }
 0x194   :  { %1697 = vmatprep.subr.bf16.mxu0 %v3531_v8  ;;  %1738 = vmatprep.subr.bf16.mxu1 %v3579_v26 }
 0x197   :  { %1698 = vmatpush1.bf16.msra.mxu0 %v3529_v10  ;;  %1739 = vmatpush1.bf16.msra.mxu1 %v3577_v28 }
 0x198   :  { %1699 = vmatprep.subr.bf16.mxu0 %v3534_v12  ;;  %1740 = vmatprep.subr.bf16.mxu1 %v3582_v30  ;;  %v470_v12 = vrot.slane %v453_v57, %v185_v20  ;;  %v3606_v20 = vld [vmem:[#allocation10 + $0xac] ss:$12 sps:$4 sm:$0xff]  }
 0x199   :  { %v3656_v57 = vld [vmem:[#allocation10 + $0xf8] ss:$12 sps:$4 sm:$0xff]  }
 0x19b   :  { %1700 = vmatpush2.bf16.msra.mxu0 %v3532_v14  ;;  %1741 = vmatpush2.bf16.msra.mxu1 %v3580_v32 }
 0x19c   :  { %1701 = vmatprep.subr.bf16.mxu0 %v3537_v21  ;;  %1742 = vmatprep.subr.bf16.mxu1 %v3585_v34  ;;  %v3609_v34 = vld [vmem:[#allocation10 + $0x94] ss:$12 sps:$4 sm:$0xff]  }
 0x19f   :  { %1702 = vmatpush2.bf16.msra.mxu0 %v3535_v23  ;;  %1743 = vmatpush2.bf16.msra.mxu1 %v3583_v36  ;;  %v3612_v36 = vld [vmem:[#allocation10 + $0x7c] ss:$12 sps:$4 sm:$0xff]  }
 0x1a0   :  { %1703 = vmatprep.subr.bf16.mxu0 %v3540_v25  ;;  %1744 = vmatprep.subr.bf16.mxu1 %v3588_v38  ;;  %v3632_v38 = vld [vmem:[#allocation10 + $0xb0] ss:$12 sps:$4 sm:$0xff]  }
 0x1a3   :  { %1704 = vmatpush2.bf16.msra.mxu0 %v3538_v27  ;;  %1745 = vmatpush2.bf16.msra.mxu1 %v3586_v41  ;;  %v3636_v41 = vld [vmem:[#allocation10 + $0x158] ss:$12 sps:$4 sm:$0xff]  }
 0x1a4   :  { %1705 = vmatprep.subr.bf16.mxu0 %v3543_v29  ;;  %1746 = vmatprep.subr.bf16.mxu1 %v3591_v43  ;;  %v3637_v43 = vld [vmem:[#allocation10 + $0x98] ss:$12 sps:$4 sm:$0xff]  }
 0x1a7   :  { %1706 = vmatpush2.bf16.msra.mxu0 %v3541_v31  ;;  %1747 = vmatpush2.bf16.msra.mxu1 %v3589_v45  ;;  %v3613_v45 = vld [vmem:[#allocation10 + $0x60] ss:$12 sps:$4 sm:$0xff]  }
 0x1a8   :  { %1707 = vmatprep.subr.bf16.mxu0 %v3546_v33  ;;  %1748 = vmatprep.subr.bf16.mxu1 %v3594_v48  ;;  %v3642_v48 = vld [vmem:[#allocation10 + $0x80] ss:$12 sps:$4 sm:$0xff]  }
 0x1ab   :  { %1708 = vmatpush2.bf16.msra.mxu0 %v3544_v35  ;;  %1749 = vmatpush2.bf16.msra.mxu1 %v3592_v50  ;;  %v3607_v35 = vld [vmem:[#allocation10 + $0x90] ss:$12 sps:$4 sm:$0xff]   ;;  %v3616_v50 = vld [vmem:[#allocation10 + $0x48] ss:$12 sps:$4 sm:$0xff]  }
 0x1ac   :  { %1709 = vmatprep.subr.bf16.mxu0 %v3549_v37  ;;  %1750 = vmatprep.subr.bf16.mxu1 %v3597_v51  ;;  %v3631_v37 = vld [vmem:[#allocation10 + $0x170] ss:$12 sps:$4 sm:$0xff]   ;;  %v3621_v51 = vld [vmem:[#allocation10 + $0x34] ss:$12 sps:$4 sm:$0xff]  }
 0x1af   :  { %1710 = vmatpush2.bf16.msra.mxu0 %v3547_v40  ;;  %1751 = vmatpush2.bf16.msra.mxu1 %v3595_v52  ;;  %v3610_v40 = vld [vmem:[#allocation10 + $0x78] ss:$12 sps:$4 sm:$0xff]   ;;  %v3647_v52 = vld [vmem:[#allocation10 + $0x68] ss:$12 sps:$4 sm:$0xff]  }
 0x1b0   :  { %1711 = vmatprep.subr.bf16.mxu0 %v3552_v42  ;;  %1752 = vmatprep.subr.bf16.mxu1 %v3600_v53  ;;  %v3615_v42 = vld [vmem:[#allocation10 + $0x64] ss:$12 sps:$4 sm:$0xff]  }
 0x1b1   :  { %v3651_v53 = vld [vmem:[#allocation10 + $0x110] ss:$12 sps:$4 sm:$0xff]  }
 0x1b3   :  { %1712 = vmatpush2.bf16.msra.mxu0 %v3550_v44  ;;  %1753 = vmatpush2.bf16.msra.mxu1 %v3598_v54  ;;  %v3641_v44 = vld [vmem:[#allocation10 + $0x140] ss:$12 sps:$4 sm:$0xff]   ;;  %v3619_v54 = vld [vmem:[#allocation10 + $0x30] ss:$12 sps:$4 sm:$0xff]  }
 0x1b4   :  { %1713 = vmatprep.subr.bf16.mxu0 %v3555_v47  ;;  %1754 = vmatprep.subr.bf16.mxu1 %v3603_v55  ;;  %v3618_v47 = vld [vmem:[#allocation10 + $0x4c] ss:$12 sps:$4 sm:$0xff]   ;;  %v3624_v55 = vld [vmem:[#allocation10 + $0x1c] ss:$12 sps:$4 sm:$0xff]  }
 0x1b7   :  { %1714 = vmatpush2.bf16.msra.mxu0 %v3553_v49  ;;  %1755 = vmatpush2.bf16.msra.mxu1 %v3601_v56  ;;  %v3646_v49 = vld [vmem:[#allocation10 + $0x128] ss:$12 sps:$4 sm:$0xff]   ;;  %v3652_v56 = vld [vmem:[#allocation10 + $0x50] ss:$12 sps:$4 sm:$0xff]  }
 0x1b8   :  { %2106 = vmatprep.subr.bf16.mxu0 %v3606_v20  ;;  %3211 = vmatprep.subr.bf16.mxu1 %v3631_v37 }
 0x1fa   :  { %v1149_v60 = vpop.f32.mrf.mxu0  ;;  %v1190_v61 = vpop.f32.mrf.mxu1 }
 0x1fb   :  { %v1150_v62 = vadd.f32 %v1149_v60, %v458_v58  ;;  %v3622_v58 = vld [vmem:[#allocation10 + $0x18] ss:$12 sps:$4 sm:$0xff]  }
 0x1fc   :  { %v1151_v46 = vpop.f32.mrf.mxu0  ;;  %v1192_v39 = vpop.f32.mrf.mxu1  ;;  %v3657_v60 = vld [vmem:[#allocation10 + $0x38] ss:$12 sps:$4 sm:$0xff]  }
 0x1fd   :  { %v1191_v63 = vadd.f32 %v1190_v61, %v1150_v62  ;;  %v1152_v1 = vadd.f32 %v1151_v46, %v462_v59  ;;  %v3627_v59 = vld [vmem:[#allocation10 + $0x4] ss:$12 sps:$4 sm:$0xff]   ;;  %v3625_v61 = vld [vmem:[#allocation10] ss:$12 sps:$4 sm:$0xff]   ;;  %v3628_v46 = vld [vmem:[#allocation10 + $0x168] ss:$12 sps:$4 sm:$0xff]  }
 0x1fe   :  { %v1153_v2 = vpop.f32.mrf.mxu0  ;;  %v1194_v3 = vpop.f32.mrf.mxu1  ;;  %v3630_v62 = vld [vmem:[#allocation10 + $0x16c] ss:$12 sps:$4 sm:$0xff]  }
 0x1ff   :  { %v1193_v4 = vadd.f32 %v1192_v39, %v1152_v1  ;;  %v1279_v5 = vmax.f32 %v1191_v63, 0.0  ;;  %v3635_v39 = vld [vmem:[#allocation10 + $0x154] ss:$12 sps:$4 sm:$0xff]   ;;  %v3633_v63 = vld [vmem:[#allocation10 + $0x150] ss:$12 sps:$4 sm:$0xff]  }
 0x200   :  { %v1154_v6 = vpop.f32.mrf.mxu0  ;;  %v1195_v7 = vpop.f32.mrf.mxu1  ;;  %v3640_v1 = vld [vmem:[#allocation10 + $0x13c] ss:$12 sps:$4 sm:$0xff]   ;;  %v3638_v2 = vld [vmem:[#allocation10 + $0x138] ss:$12 sps:$4 sm:$0xff]  }
 0x201   :  { %v1280_v8 = vmax.f32 %v1193_v4, 0.0  ;;  %v1283_v10 = vpack.c.bf16 %v1279_v5, %v1279_v5  ;;  %v3645_v3 = vld [vmem:[#allocation10 + $0x124] ss:$12 sps:$4 sm:$0xff]   ;;  %v3643_v4 = vld [vmem:[#allocation10 + $0x120] ss:$12 sps:$4 sm:$0xff]  }
 0x202   :  { %v3650_v5 = vld [vmem:[#allocation10 + $0x10c] ss:$12 sps:$4 sm:$0xff]   ;;  %v3648_v6 = vld [vmem:[#allocation10 + $0x108] ss:$12 sps:$4 sm:$0xff]  }
 0x203   :  { %v1284_v9 = vpack.c.bf16 %v1280_v8, %v1280_v8  ;;  %v3655_v7 = vld [vmem:[#allocation10 + $0xf4] ss:$12 sps:$4 sm:$0xff]   ;;  %v3653_v8 = vld [vmem:[#allocation10 + $0xf0] ss:$12 sps:$4 sm:$0xff]  }
 0x205   :  { %1715 = vmatprep.mubr.bf16.mxu0 %v1284_v9  ;;  %v3660_v9 = vld [vmem:[#allocation10 + $0xdc] ss:$12 sps:$4 sm:$0xff]  }
 0x206   :  { %1716 = vmatmul.mubr.bf16.vlgmr.msra.gmra.mxu0 %v1283_v10  ;;  %v3661_v10 = vld [vmem:[#allocation10 + $0xe0] ss:$12 sps:$4 sm:$0xff]  }
 0x207   :  { %2107 = vmatpush1.bf16.msra.mxu0 %v3604_v15 }
 0x208   :  { %2108 = vmatprep.subr.bf16.mxu0 %v3609_v34 }
 0x20b   :  { %2109 = vmatpush1.bf16.msra.mxu0 %v3607_v35 }
 0x20c   :  { %2110 = vmatprep.subr.bf16.mxu0 %v3612_v36 }
 0x20f   :  { %2111 = vmatpush1.bf16.msra.mxu0 %v3610_v40 }
 0x210   :  { %2112 = vmatprep.subr.bf16.mxu0 %v3615_v42  ;;  %v3695_v42 = vld [vmem:[#allocation11 + $0x170] ss:$8 sps:$4 sm:$0xff]  }
 0x213   :  { %2113 = vmatpush1.bf16.msra.mxu0 %v3613_v45  ;;  %v3703_v45 = vld [vmem:[#allocation11 + $0x164] ss:$8 sps:$4 sm:$0xff]  }
 0x214   :  { %2114 = vmatprep.subr.bf16.mxu0 %v3618_v47  ;;  %v3671_v47 = vld [vmem:[#allocation11 + $0x60] ss:$8 sps:$4 sm:$0xff]  }
 0x217   :  { %2115 = vmatpush1.bf16.msra.mxu0 %v3616_v50  ;;  %v3709_v50 = vld [vmem:[#allocation11 + $0x154] ss:$8 sps:$4 sm:$0xff]  }
 0x218   :  { %2116 = vmatprep.subr.bf16.mxu0 %v3621_v51  ;;  %v3674_v51 = vld [vmem:[#allocation11 + $0x50] ss:$8 sps:$4 sm:$0xff]  }
 0x21b   :  { %2117 = vmatpush1.bf16.msra.mxu0 %v3619_v54  ;;  %v3715_v54 = vld [vmem:[#allocation11 + $0x144] ss:$8 sps:$4 sm:$0xff]  }
 0x21c   :  { %2118 = vmatprep.subr.bf16.mxu0 %v3624_v55  ;;  %v3677_v55 = vld [vmem:[#allocation11 + $0x40] ss:$8 sps:$4 sm:$0xff]  }
 0x21f   :  { %2119 = vmatpush1.bf16.msra.mxu0 %v3622_v58  ;;  %v3721_v58 = vld [vmem:[#allocation11 + $0x134] ss:$8 sps:$4 sm:$0xff]  }
 0x220   :  { %2120 = vmatprep.subr.bf16.mxu0 %v3627_v59  ;;  %v3680_v59 = vld [vmem:[#allocation11 + $0x30] ss:$8 sps:$4 sm:$0xff]  }
 0x223   :  { %2121 = vmatpush1.bf16.msra.mxu0 %v3625_v61  ;;  %v3727_v61 = vld [vmem:[#allocation11 + $0x124] ss:$8 sps:$4 sm:$0xff]  }
 0x224   :  { %2122 = vmatprep.subr.bf16.mxu0 %v3630_v62  ;;  %v3683_v62 = vld [vmem:[#allocation11 + $0x20] ss:$8 sps:$4 sm:$0xff]  }
 0x227   :  { %2123 = vmatpush2.bf16.msra.mxu0 %v3628_v46  ;;  %v3725_v46 = vld [vmem:[#allocation11 + $0x120] ss:$8 sps:$4 sm:$0xff]  }
 0x228   :  { %2124 = vmatprep.subr.bf16.mxu0 %v3635_v39  ;;  %v3688_v39 = vld [vmem:[#allocation11 + $0x14] ss:$8 sps:$4 sm:$0xff]  }
 0x22b   :  { %2125 = vmatpush2.bf16.msra.mxu0 %v3633_v63  ;;  %v3686_v63 = vld [vmem:[#allocation11 + $0x10] ss:$8 sps:$4 sm:$0xff]  }
 0x22c   :  { %2126 = vmatprep.subr.bf16.mxu0 %v3640_v1  ;;  %v3691_v1 = vld [vmem:[#allocation11 + $0x4] ss:$8 sps:$4 sm:$0xff]  }
 0x22f   :  { %2127 = vmatpush2.bf16.msra.mxu0 %v3638_v2  ;;  %v3689_v2 = vld [vmem:[#allocation11] ss:$8 sps:$4 sm:$0xff]  }
 0x230   :  { %2128 = vmatprep.subr.bf16.mxu0 %v3645_v3  ;;  %v3694_v3 = vld [vmem:[#allocation11 + $0xf4] ss:$8 sps:$4 sm:$0xff]  }
 0x233   :  { %2129 = vmatpush2.bf16.msra.mxu0 %v3643_v4  ;;  %v3692_v4 = vld [vmem:[#allocation11 + $0xf0] ss:$8 sps:$4 sm:$0xff]  }
 0x234   :  { %2130 = vmatprep.subr.bf16.mxu0 %v3650_v5  ;;  %v3700_v5 = vld [vmem:[#allocation11 + $0xe4] ss:$8 sps:$4 sm:$0xff]  }
 0x237   :  { %2131 = vmatpush2.bf16.msra.mxu0 %v3648_v6  ;;  %v3698_v6 = vld [vmem:[#allocation11 + $0xe0] ss:$8 sps:$4 sm:$0xff]  }
 0x238   :  { %2132 = vmatprep.subr.bf16.mxu0 %v3655_v7  ;;  %v3706_v7 = vld [vmem:[#allocation11 + $0xd4] ss:$8 sps:$4 sm:$0xff]  }
 0x23a   :  { %v1231_v13 = vpop.f32.mrf.mxu0  ;;  %v1272_v14 = vpop.f32.mrf.mxu1 }
 0x23b   :  { %v1232_v18 = vadd.f32 %v1231_v13, %v466_v11  ;;  %2133 = vmatpush2.bf16.msra.mxu0 %v3653_v8  ;;  %v3658_v11 = vld [vmem:[#allocation10 + $0xd8] ss:$12 sps:$4 sm:$0xff]  }
 0x23c   :  { %v1233_v21 = vpop.f32.mrf.mxu0  ;;  %v1274_v22 = vpop.f32.mrf.mxu1  ;;  %2134 = vmatprep.subr.bf16.mxu0 %v3660_v9  ;;  %v3665_v13 = vld [vmem:[#allocation10 + $0xc4] ss:$12 sps:$4 sm:$0xff]  }
 0x23d   :  { %v1273_v23 = vadd.f32 %v1272_v14, %v1232_v18  ;;  %v1234_v24 = vadd.f32 %v1233_v21, %v470_v12  ;;  %v3662_v12 = vld [vmem:[#allocation10 + $0x20] ss:$12 sps:$4 sm:$0xff]   ;;  %v3666_v14 = vld [vmem:[#allocation10 + $0xc8] ss:$12 sps:$4 sm:$0xff]   ;;  %v3704_v8 = vld [vmem:[#allocation11 + $0xd0] ss:$8 sps:$4 sm:$0xff]  }
 0x23e   :  { %v1235_v25 = vpop.f32.mrf.mxu0  ;;  %v1276_v26 = vpop.f32.mrf.mxu1  ;;  %v3663_v18 = vld [vmem:[#allocation10 + $0xc0] ss:$12 sps:$4 sm:$0xff]   ;;  %v3667_v21 = vld [vmem:[#allocation10 + $0x8] ss:$12 sps:$4 sm:$0xff]  }
 0x23f   :  { %v1275_v27 = vadd.f32 %v1274_v22, %v1234_v24  ;;  %v1281_v28 = vmax.f32 %v1273_v23, 0.0  ;;  %2135 = vmatpush2.bf16.msra.mxu0 %v3658_v11  ;;  %v3670_v22 = vld [vmem:[#allocation11 + $0x74] ss:$8 sps:$4 sm:$0xff]   ;;  %v3712_v9 = vld [vmem:[#allocation11 + $0xc4] ss:$8 sps:$4 sm:$0xff]  }
 0x240   :  { %v1236_v29 = vpop.f32.mrf.mxu0  ;;  %v1277_v30 = vpop.f32.mrf.mxu1  ;;  %2136 = vmatprep.subr.bf16.mxu0 %v3665_v13  ;;  %v3697_v23 = vld [vmem:[#allocation11 + $0x174] ss:$8 sps:$4 sm:$0xff]   ;;  %v3724_v13 = vld [vmem:[#allocation11 + $0xa4] ss:$8 sps:$4 sm:$0xff]  }
 0x241   :  { %v1282_v31 = vmax.f32 %v1275_v27, 0.0  ;;  %v1285_v33 = vpack.c.bf16 %v1281_v28, %v1281_v28  ;;  %v1351_v28 = vld [vmem:[%s4156_s6] sm:$0x3]  ;;  %v3718_v11 = vld [vmem:[#allocation11 + $0xb4] ss:$8 sps:$4 sm:$0xff]  }
 0x242   :  { %v1356_v29 = vrot.slane %v1351_v28, %v4091_v16  ;;  %v1360_v30 = vrot.slane %v1351_v28, %v4100_v19  ;;  %v3740_v28 = vld [vmem:[#allocation13 + $0x78] sm:$0xff]  }
 0x243   :  { %v1286_v32 = vpack.c.bf16 %v1282_v31, %v1282_v31  ;;  %2137 = vmatpush2.bf16.msra.mxu0 %v3663_v18  ;;  %v3730_v18 = vld [vmem:[#allocation11 + $0x94] ss:$8 sps:$4 sm:$0xff]  }
 0x244   :  { %2534 = vmatprep.subr.bf16.mxu0 %v3697_v23  ;;  %v3731_v23 = vld [vmem:[#allocation11 + $0x110] ss:$8 sps:$4 sm:$0xff]  }
 0x245   :  { %1756 = vmatprep.mubr.bf16.mxu1 %v1286_v32 }
 0x246   :  { %1757 = vmatmul.mubr.bf16.vlgmr.msra.gmra.mxu1 %v1285_v33 }
 0x247   :  { %3212 = vmatpush3.bf16.msra.mxu1 %v3632_v38 }
 0x248   :  { %3213 = vmatprep.subr.bf16.mxu1 %v3636_v41  ;;  %v3668_v41 = vld [vmem:[#allocation11 + $0x70] ss:$8 sps:$4 sm:$0xff]  }
 0x24b   :  { %3214 = vmatpush3.bf16.msra.mxu1 %v3637_v43 }
 0x24c   :  { %3215 = vmatprep.subr.bf16.mxu1 %v3641_v44  ;;  %v3673_v44 = vld [vmem:[#allocation11 + $0x64] ss:$8 sps:$4 sm:$0xff]  }
 0x24f   :  { %3216 = vmatpush3.bf16.msra.mxu1 %v3642_v48  ;;  %v3701_v48 = vld [vmem:[#allocation11 + $0x160] ss:$8 sps:$4 sm:$0xff]  }
 0x250   :  { %3217 = vmatprep.subr.bf16.mxu1 %v3646_v49  ;;  %v3676_v49 = vld [vmem:[#allocation11 + $0x54] ss:$8 sps:$4 sm:$0xff]  }
 0x253   :  { %3218 = vmatpush3.bf16.msra.mxu1 %v3647_v52  ;;  %v3707_v52 = vld [vmem:[#allocation11 + $0x150] ss:$8 sps:$4 sm:$0xff]  }
 0x254   :  { %3219 = vmatprep.subr.bf16.mxu1 %v3651_v53  ;;  %v3679_v53 = vld [vmem:[#allocation11 + $0x44] ss:$8 sps:$4 sm:$0xff]  }
 0x257   :  { %3220 = vmatpush3.bf16.msra.mxu1 %v3652_v56  ;;  %v3713_v56 = vld [vmem:[#allocation11 + $0x140] ss:$8 sps:$4 sm:$0xff]  }
 0x258   :  { %3221 = vmatprep.subr.bf16.mxu1 %v3656_v57  ;;  %v3682_v57 = vld [vmem:[#allocation11 + $0x34] ss:$8 sps:$4 sm:$0xff]  }
 0x25b   :  { %3222 = vmatpush3.bf16.msra.mxu1 %v3657_v60  ;;  %v3685_v60 = vld [vmem:[#allocation11 + $0x24] ss:$8 sps:$4 sm:$0xff]  }
 0x25c   :  { %3223 = vmatprep.subr.bf16.mxu1 %v3661_v10  ;;  %v3710_v10 = vld [vmem:[#allocation11 + $0xc0] ss:$8 sps:$4 sm:$0xff]  }
 0x25f   :  { %3224 = vmatpush3.bf16.msra.mxu1 %v3662_v12  ;;  %v3716_v12 = vld [vmem:[#allocation11 + $0xb0] ss:$8 sps:$4 sm:$0xff]  }
 0x260   :  { %3225 = vmatprep.subr.bf16.mxu1 %v3666_v14  ;;  %v3722_v14 = vld [vmem:[#allocation11 + $0xa0] ss:$8 sps:$4 sm:$0xff]  }
 0x263   :  { %3226 = vmatpush3.bf16.msra.mxu1 %v3667_v21  ;;  %v3728_v21 = vld [vmem:[#allocation11 + $0x90] ss:$8 sps:$4 sm:$0xff]  }
 0x264   :  { %2493 = vmatprep.subr.bf16.mxu1 %v3670_v22  ;;  %v3733_v22 = vld [vmem:[#allocation11 + $0x114] ss:$8 sps:$4 sm:$0xff]  }
 0x2c6   :  { %v1717_v24 = vpop.f32.mrf.mxu0 }
 0x2c7   :  { %v1718_v31 = vadd.f32 %v1717_v24, %v1356_v29  ;;  %v3736_v24 = vld [vmem:[#allocation11 + $0x84] ss:$8 sps:$4 sm:$0xff]   ;;  %v1833_v29 = vld [vmem:[%s4158_s8] sm:$0x7] }
 0x2c8   :  { %v1719_v25 = vpop.f32.mrf.mxu0 }
 0x2c9   :  { %v1720_v33 = vadd.f32 %v1719_v25, %v1360_v30  ;;  %v3734_v25 = vld [vmem:[#allocation11 + $0x80] ss:$8 sps:$4 sm:$0xff]   ;;  %v1838_v30 = vrot.slane %v1833_v29, %v4091_v16 }
 0x2ca   :  { %v1721_v26 = vpop.f32.mrf.mxu0 }
 0x2cb   :  { %v3739_v26 = vld [vmem:[#allocation11 + $0x104] ss:$8 sps:$4 sm:$0xff]  }
 0x2cc   :  { %v1722_v27 = vpop.f32.mrf.mxu0 }
 0x2cd   :  { %v3737_v27 = vld [vmem:[#allocation11 + $0x100] ss:$8 sps:$4 sm:$0xff]  }
 0x306   :  { %v1758_v32 = vpop.f32.mrf.mxu1 }
 0x307   :  { %v1759_v15 = vadd.f32 %v1758_v32, %v1718_v31  ;;  %v1842_v31 = vrot.slane %v1833_v29, %v4100_v19 }
 0x308   :  { %v1760_v20 = vpop.f32.mrf.mxu1 }
 0x309   :  { %v1761_v34 = vadd.f32 %v1760_v20, %v1720_v33  ;;  %v1765_v35 = vmax.f32 %v1759_v15, 0.0  ;;  %v1846_v20 = vrot.slane %v1833_v29, %v4094_v17  ;;  %v3743_v17 = vld [vmem:[#allocation13 + $0x30] sm:$0xff]   ;;  %v3763_v29 = vld [vmem:[#allocation14] sm:$0xff]  }
 0x30a   :  { %v1762_v36 = vpop.f32.mrf.mxu1 }
 0x30b   :  { %v1766_v37 = vmax.f32 %v1761_v34, 0.0  ;;  %v1767_v43 = vpack.c.bf16 %v1765_v35, %v1765_v35 }
 0x30c   :  { %v1763_v38 = vpop.f32.mrf.mxu1 }
 0x30d   :  { %v1768_v40 = vpack.c.bf16 %v1766_v37, %v1766_v37 }
 0x30f   :  { %2138 = vmatprep.mubr.bf16.mxu0 %v1768_v40  ;;  %2179 = vmatprep.mubr.bf16.mxu1 %v1768_v40 }
 0x310   :  { %2139 = vmatmul.mubr.bf16.vlgmr.msra.gmra.mxu0 %v1767_v43  ;;  %2180 = vmatmul.mubr.bf16.vlgmr.msra.gmra.mxu1 %v1767_v43 }
 0x311   :  { %2494 = vmatpush1.bf16.msra.mxu1 %v3668_v41  ;;  %2535 = vmatpush1.bf16.msra.mxu0 %v3695_v42 }
 0x312   :  { %2495 = vmatprep.subr.bf16.mxu1 %v3673_v44  ;;  %2536 = vmatprep.subr.bf16.mxu0 %v3703_v45 }
 0x313   :  { %2566 = vmatprep.mubr.bf16.mxu0 %v3972_v0  ;;  %v3719_v0 = vld [vmem:[#allocation11 + $0x130] ss:$8 sps:$4 sm:$0xff]  }
 0x315   :  { %2496 = vmatpush1.bf16.msra.mxu1 %v3671_v47  ;;  %2537 = vmatpush1.bf16.msra.mxu0 %v3701_v48 }
 0x316   :  { %2497 = vmatprep.subr.bf16.mxu1 %v3676_v49  ;;  %2538 = vmatprep.subr.bf16.mxu0 %v3709_v50  ;;  %v3741_v50 = vld [vmem:[#allocation13 + $0x38] sm:$0xff]  }
 0x319   :  { %2498 = vmatpush1.bf16.msra.mxu1 %v3674_v51  ;;  %2539 = vmatpush1.bf16.msra.mxu0 %v3707_v52  ;;  %v3742_v52 = vld [vmem:[#allocation13 + $0x70] sm:$0xff]  }
 0x31a   :  { %2499 = vmatprep.subr.bf16.mxu1 %v3679_v53  ;;  %2540 = vmatprep.subr.bf16.mxu0 %v3715_v54  ;;  %v3744_v53 = vld [vmem:[#allocation13 + $0x68] sm:$0xff]  }
 0x31b   :  { %v3745_v54 = vld [vmem:[#allocation13 + $0x28] sm:$0xff]  }
 0x31d   :  { %2500 = vmatpush1.bf16.msra.mxu1 %v3677_v55  ;;  %2541 = vmatpush1.bf16.msra.mxu0 %v3713_v56  ;;  %v3746_v55 = vld [vmem:[#allocation13 + $0x60] sm:$0xff]  }
 0x31e   :  { %2501 = vmatprep.subr.bf16.mxu1 %v3682_v57  ;;  %2542 = vmatprep.subr.bf16.mxu0 %v3721_v58  ;;  %v3747_v56 = vld [vmem:[#allocation13 + $0x20] sm:$0xff]   ;;  %v3748_v57 = vld [vmem:[#allocation13 + $0x58] sm:$0xff]  }
 0x31f   :  { %v3749_v58 = vld [vmem:[#allocation13 + $0x18] sm:$0xff]  }
 0x321   :  { %2502 = vmatpush1.bf16.msra.mxu1 %v3680_v59  ;;  %2543 = vmatpush1.bf16.msra.mxu0 %v3719_v0  ;;  %v3750_v59 = vld [vmem:[#allocation13 + $0x50] sm:$0xff]  }
 0x322   :  { %2503 = vmatprep.subr.bf16.mxu1 %v3685_v60  ;;  %2544 = vmatprep.subr.bf16.mxu0 %v3727_v61  ;;  %v3751_v0 = vld [vmem:[#allocation13 + $0x10] sm:$0xff]   ;;  %v3752_v60 = vld [vmem:[#allocation13 + $0x48] sm:$0xff]  }
 0x323   :  { %v3753_v61 = vld [vmem:[#allocation13 + $0x8] sm:$0xff]  }
 0x325   :  { %2504 = vmatpush1.bf16.msra.mxu1 %v3683_v62  ;;  %2545 = vmatpush1.bf16.msra.mxu0 %v3725_v46  ;;  %v3754_v62 = vld [vmem:[#allocation13 + $0x40] sm:$0xff]  }
 0x326   :  { %2505 = vmatprep.subr.bf16.mxu1 %v3688_v39  ;;  %2546 = vmatprep.subr.bf16.mxu0 %v3733_v22  ;;  %v3755_v46 = vld [vmem:[#allocation13] sm:$0xff]   ;;  %v3756_v39 = vld [vmem:[#allocation14 + $0x38] sm:$0xff]  }
 0x329   :  { %2506 = vmatpush1.bf16.msra.mxu1 %v3686_v63  ;;  %2547 = vmatpush1.bf16.msra.mxu0 %v3731_v23  ;;  %v3973_v63 = vmov 0.0  }
 0x32a   :  { %2507 = vmatprep.subr.bf16.mxu1 %v3691_v1  ;;  %2548 = vmatprep.subr.bf16.mxu0 %v3739_v26  ;;  %v3757_v1 = vld [vmem:[#allocation14 + $0x30] sm:$0xff]  }
 0x32d   :  { %2508 = vmatpush1.bf16.msra.mxu1 %v3689_v2  ;;  %2549 = vmatpush1.bf16.msra.mxu0 %v3737_v27  ;;  %v3758_v2 = vld [vmem:[#allocation14 + $0x28] sm:$0xff]  }
 0x32e   :  { %2509 = vmatprep.subr.bf16.mxu1 %v3694_v3  ;;  %3233 = vmatprep.subr.bf16.mxu0 %v3740_v28  ;;  %v3759_v3 = vld [vmem:[#allocation14 + $0x20] sm:$0xff]  }
 0x331   :  { %2510 = vmatpush2.bf16.msra.mxu1 %v3692_v4  ;;  %v3760_v4 = vld [vmem:[#allocation14 + $0x18] sm:$0xff]  }
 0x332   :  { %2511 = vmatprep.subr.bf16.mxu1 %v3700_v5  ;;  %v2241_v5 = vld [vmem:[%s4160_s10] sm:$0x3] }
 0x335   :  { %2512 = vmatpush2.bf16.msra.mxu1 %v3698_v6  ;;  %v2246_v6 = vrot.slane %v2241_v5, %v4091_v16  ;;  %v3761_v16 = vld [vmem:[#allocation14 + $0x10] sm:$0xff]  }
 0x336   :  { %2513 = vmatprep.subr.bf16.mxu1 %v3706_v7  ;;  %v2250_v7 = vrot.slane %v2241_v5, %v4100_v19  ;;  %v3762_v19 = vld [vmem:[#allocation14 + $0x8] sm:$0xff]  }
 0x339   :  { %2514 = vmatpush2.bf16.msra.mxu1 %v3704_v8 }
 0x33a   :  { %2515 = vmatprep.subr.bf16.mxu1 %v3712_v9 }
 0x33d   :  { %2516 = vmatpush2.bf16.msra.mxu1 %v3710_v10 }
 0x33e   :  { %2517 = vmatprep.subr.bf16.mxu1 %v3718_v11 }
 0x341   :  { %2518 = vmatpush2.bf16.msra.mxu1 %v3716_v12 }
 0x342   :  { %2519 = vmatprep.subr.bf16.mxu1 %v3724_v13 }
 0x345   :  { %2520 = vmatpush2.bf16.msra.mxu1 %v3722_v14 }
 0x346   :  { %2521 = vmatprep.subr.bf16.mxu1 %v3730_v18 }
 0x349   :  { %2522 = vmatpush2.bf16.msra.mxu1 %v3728_v21 }
 0x34a   :  { %2523 = vmatprep.subr.bf16.mxu1 %v3736_v24 }
 0x34d   :  { %2524 = vmatpush2.bf16.msra.mxu1 %v3734_v25 }
 0x34e   :  { %3264 = vmatprep.subr.bf16.mxu1 %v3973_v63 }
 0x3d0   :  { %v2140_v32 = vpop.f32.mrf.mxu0  ;;  %v3227_v33 = vpop.f32.mrf.mxu1 }
 0x3d1   :  { %v2141_v15 = vadd.f32 %v2140_v32, %v1838_v30 }
 0x3d2   :  { %v2142_v34 = vpop.f32.mrf.mxu0  ;;  %v3228_v35 = vpop.f32.mrf.mxu1 }
 0x3d3   :  { %v2143_v36 = vadd.f32 %v2142_v34, %v1842_v31  ;;  %v3229_v37 = vadd.f32 %v3228_v35, %v3227_v33  ;;  %v2187_v38 = vmax.f32 %v2141_v15, 0.0  ;;  %v3185_v31 = vld [vmem:[%s4162_s12] ss:$0 sm:$0xff]  ;;  %s3924_s12 = scalar_lea.vmem %s2875_s19, 128 }
 0x3d4   :  { %v2144_v40 = vpop.f32.mrf.mxu0  ;;  %v3230_v41 = vpop.f32.mrf.mxu1  ;;  %p3925_p12 = scmp.ne.s32.totalorder %s2875_s19, %s3924_s12  ;;  %p3930_p0 = scmp.lt.s32.totalorder %s3924_s12, %s3924_s12 }
 0x3d5   :  { %v2188_v42 = vmax.f32 %v2143_v36, 0.0  ;;  %v2182_v43 = vadd.f32 %v3229_v37, %v1846_v20  ;;  %v2190_v49 = vpack.c.bf16 %v2187_v38, %v2187_v38  ;;  %v3202_v37 = vld [vmem:[%s4164_s14] ss:$0 sm:$0xff] }
 0x3d6   :  { %v2145_v44 = vpop.f32.mrf.mxu0  ;;  %v3231_v45 = vpop.f32.mrf.mxu1  ;;  %p3931_p1 = por %p3930_p0, %p3929_p13 }
 0x3d7   :  { %v2191_v47 = vpack.c.bf16 %v2188_v42, %v2188_v42  ;;  %v2189_v48 = vmax.f32 %v2182_v43, 0.0 }
 0x3d8   :  { %p3932_p2 = pnand %p3931_p1, %p3925_p12 }
 0x3d9   :  { %v2192_v51 = vpack.c.bf16 %v2189_v48, %v2189_v48  ;;  %2525 = vmatprep.mubr.bf16.mxu1 %v2191_v47 }
 0x3da   :  { %2526 = vmatmul.mubr.bf16.vlgmr.msra.gmra.mxu1 %v2190_v49 }
 0x3db   :  { %2567 = vmatmul.mubr.bf16.vlgmr.msra.gmra.mxu0 %v2192_v51  ;;  %3265 = vmatpush3.bf16.msra.mxu1 %v3756_v39 }
 0x3dc   :  { %3234 = vmatpush3.bf16.msra.mxu0 %v3741_v50  ;;  %3266 = vmatprep.subr.bf16.mxu1 %v3973_v63 }
 0x3dd   :  { %3235 = vmatprep.subr.bf16.mxu0 %v3742_v52  ;;  %3280 = vmatprep.mubr.msk.bf16.mxu1 %vm3974_vm1, %v3973_v63 }
 0x3df   :  { %3267 = vmatpush3.bf16.msra.mxu1 %v3757_v1 }
 0x3e0   :  { %3236 = vmatpush3.bf16.msra.mxu0 %v3743_v17  ;;  %3268 = vmatprep.subr.bf16.mxu1 %v3973_v63 }
 0x3e1   :  { %3237 = vmatprep.subr.bf16.mxu0 %v3744_v53 }
 0x3e3   :  { %3269 = vmatpush3.bf16.msra.mxu1 %v3758_v2 }
 0x3e4   :  { %3238 = vmatpush3.bf16.msra.mxu0 %v3745_v54  ;;  %3270 = vmatprep.subr.bf16.mxu1 %v3973_v63 }
 0x3e5   :  { %3239 = vmatprep.subr.bf16.mxu0 %v3746_v55 }
 0x3e7   :  { %3271 = vmatpush3.bf16.msra.mxu1 %v3759_v3 }
 0x3e8   :  { %3240 = vmatpush3.bf16.msra.mxu0 %v3747_v56  ;;  %3272 = vmatprep.subr.bf16.mxu1 %v3973_v63 }
 0x3e9   :  { %3241 = vmatprep.subr.bf16.mxu0 %v3748_v57 }
 0x3eb   :  { %3273 = vmatpush3.bf16.msra.mxu1 %v3760_v4 }
 0x3ec   :  { %3242 = vmatpush3.bf16.msra.mxu0 %v3749_v58  ;;  %3274 = vmatprep.subr.bf16.mxu1 %v3973_v63 }
 0x3ed   :  { %3243 = vmatprep.subr.bf16.mxu0 %v3750_v59 }
 0x3ef   :  { %3275 = vmatpush3.bf16.msra.mxu1 %v3761_v16 }
 0x3f0   :  { %3244 = vmatpush3.bf16.msra.mxu0 %v3751_v0  ;;  %3276 = vmatprep.subr.bf16.mxu1 %v3973_v63 }
 0x3f1   :  { %3245 = vmatprep.subr.bf16.mxu0 %v3752_v60 }
 0x3f3   :  { %3277 = vmatpush3.bf16.msra.mxu1 %v3762_v19 }
 0x3f4   :  { %3246 = vmatpush3.bf16.msra.mxu0 %v3753_v61  ;;  %3278 = vmatprep.subr.bf16.mxu1 %v3973_v63 }
 0x3f5   :  { %3247 = vmatprep.subr.bf16.mxu0 %v3754_v62 }
 0x3f7   :  { %3279 = vmatpush3.bf16.msra.mxu1 %v3763_v29 }
 0x3f8   :  { %3248 = vmatpush3.bf16.msra.mxu0 %v3755_v46 }
 0x49a   :  { %v2527_v8 = vpop.f32.mrf.mxu1 }
 0x49b   :  { %v2528_v9 = vadd.f32 %v2527_v8, %v2246_v6  ;;  %v2568_v10 = vpop.f32.mrf.mxu0 }
 0x49c   :  { %v2529_v11 = vpop.f32.mrf.mxu1 }
 0x49d   :  { %v2569_v12 = vadd.f32 %v2568_v10, %v2528_v9  ;;  %v2530_v13 = vadd.f32 %v2529_v11, %v2250_v7  ;;  %v2570_v14 = vpop.f32.mrf.mxu0 }
 0x49e   :  { %v2531_v18 = vpop.f32.mrf.mxu1 }
 0x49f   :  { %v2571_v21 = vadd.f32 %v2570_v14, %v2530_v13  ;;  %v2572_v22 = vpop.f32.mrf.mxu0  ;;  %v2575_v23 = vmax.f32 %v2569_v12, 0.0 }
 0x4a0   :  { %v2532_v24 = vpop.f32.mrf.mxu1 }
 0x4a1   :  { %v2576_v25 = vmax.f32 %v2571_v21, 0.0  ;;  %v2573_v26 = vpop.f32.mrf.mxu0  ;;  %v2577_v28 = vpack.c.bf16 %v2575_v23, %v2575_v23 }
 0x4a3   :  { %v2578_v27 = vpack.c.bf16 %v2576_v25, %v2576_v25 }
 0x4a5   :  { %2746 = vmatprep.mubr.bf16.mxu0 %v2578_v27 }
 0x4a6   :  { %2747 = vmatmul.mubr.bf16.vlgmr.msra.gmra.mxu0 %v2577_v28 }
 0x566   :  { %v3249_v30 = vpop.f32.mrf.mxu0 }
 0x568   :  { %v3250_v32 = vpop.f32.mrf.mxu0 }
 0x569   :  { %v3251_v33 = vadd.f32 %v3250_v32, %v3249_v30 }
 0x56a   :  { %v3252_v15 = vpop.f32.mrf.mxu0 }
 0x56b   :  { %v2749_v20 = vadd.f32 %v3251_v33, %v3185_v31 }
 0x56c   :  { %v3253_v34 = vpop.f32.mrf.mxu0 }
 0x56d   :  { %v2754_v35 = vmax.f32 %v2749_v20, 0.0 }
 0x56f   :  { %v2755_v36 = vpack.c.bf16 %v2754_v35, %v2754_v35 }
 0x571   :  { %3281 = vmatmul.mubr.bf16.vlgmr.msra.gmra.mxu1 %v2755_v36 }
 0x631   :  { %v2861_v38 = vpop.f32.mrf.mxu1 }
 0x632   :  { %v2862_v40 = vadd.f32 %v3202_v37, %v2861_v38 }
 0x633   :  { %v3282_v41 = vpop.f32.mrf.mxu1 }
 0x634   :  { %2867 = vst [vmem:[#allocation16] sm:$0xff] %v2862_v40 }
 0x635   :  { %v2864_v42 = vpop.f32.mrf.mxu1 }
 0x636   :  { %3935 = shalt.err (!%p3932_p2)
}
 0x637   :  { %2877 = dma.vmem_to_hbm [thread:$0]  %s2875_s19, 128, %s4165_s15, [#allocation4]   ;;  %v3283_v43 = vpop.f32.mrf.mxu1 }
 0x638   :  { %3954 = dma.done.wait [#allocation4], 128  }
 0x639   :  { %3955 = vsyncadd [#allocation4], 4294967168 }
 0x63a   :  { %2881 = vsyncpa [#allocation3], 1 }
 0x63b   :  { %2882 = vsyncpa [#allocation6], 1 }
 0x63c   :  { %2883 = vsyncpa [#allocation9], 1 }
 0x63d   :  { %2884 = vsyncpa [#allocation12], 1 }
 0x63e   :  { %2885 = vsyncpa [#allocation15], 1 }
 0x63f   :  { %2886 = vsyncpa [#allocation4], 1 }

</bundles_post_ra>
